<compile_context>
chip_gen: v7x
topology: tpu7x:2x2x1
jax: 0.10.0
libtpu: 0.0.40
codegen_flags: <defaults>
</compile_context>

<pallas_src>
import functools

import jax
import jax.numpy as jnp
from jax.experimental import pallas as pl
from jax.experimental.pallas import tpu as pltpu


def _dconv_kernel(x_ref, w_ref, o_ref, xpad_ref, *, C, O, H, W, KH, KW,
                  Ho, Wo, stride, padding):
    """One batch element: fused zero-pad + im2col + single MXU matmul.

    x_ref    : (1, C, H, W)    f32  shuffled, un-padded activation (VMEM)
    w_ref    : (O, KH*KW*C)    bf16 weights, columns ordered (dh, dw, c)
    o_ref    : (1, O, Ho*Wo)   f32  lane-dense output (Ho*Wo multiple of 128)
    xpad_ref : (C, Hp, Wp)     f32  VMEM scratch holding the zero-padded tile
    """
    # Fused zero-padding: zero the scratch, then drop the activation into the
    # interior. (Unconditional zero: scratch is a few KB, and with "parallel"
    # grid sharding we cannot rely on step 0 having run on this core.)
    xpad_ref[...] = jnp.zeros_like(xpad_ref)
    xpad_ref[:, padding:padding + H, padding:padding + W] = x_ref[0]
    xpad = xpad_ref[...]

    # im2col slab (KH*KW*C, Ho*Wo); row order (dh, dw, c) matches w_ref columns.
    taps = []
    for dh in range(KH):
        for dw in range(KW):
            patch = xpad[:, dh:dh + Ho * stride:stride,
                         dw:dw + Wo * stride:stride]          # (C, Ho, Wo)
            taps.append(patch.reshape(C, Ho * Wo))
    slab = jnp.concatenate(taps, axis=0).astype(jnp.bfloat16)  # (KH*KW*C, Ho*Wo)

    # One (O, K) x (K, N) MXU matmul, f32 accumulation, lane-dense store.
    acc = jnp.dot(w_ref[...], slab, preferred_element_type=jnp.float32)
    o_ref[0] = acc.astype(o_ref.dtype)


def dconv_shuffle_forward(x, weight, key, *, stride=1, padding=1):
    """Forward pass of Dconv_shuffle.

    x      : (B, C, H, W) float32, NCHW
    weight : (O, C, KH, KW) float32 (PyTorch conv weight layout, no bias)
    key    : PRNG key for this forward's per-channel shuffle
    """
    B, C, H, W = x.shape
    O, Cw, KH, KW = weight.shape
    assert Cw == C
    S = H * W

    # --- per-channel random shuffle of spatial positions (shared across batch) ---
    keys = jax.random.split(key, C)
    perms = jax.vmap(lambda k: jax.random.permutation(k, S))(keys)        # (C, S)
    x_shuf = jnp.take_along_axis(x.reshape(B, C, S), perms[None, :, :], axis=2)
    x_shuf = x_shuf.reshape(B, C, H, W)
    # TODO(synk): fuse this gather into the kernel (scalar-prefetched indices)
    # to remove the remaining extra HBM round trip of the activation.

    Hp, Wp = H + 2 * padding, W + 2 * padding
    Ho = (Hp - KH) // stride + 1
    Wo = (Wp - KW) // stride + 1
    S_out = Ho * Wo

    # Weights -> (O, KH*KW*C), (dh, dw, c)-major, bf16 (f32 accumulate in kernel).
    w_bf = jnp.transpose(weight, (0, 2, 3, 1)).reshape(O, KH * KW * C)
    w_bf = w_bf.astype(jnp.bfloat16)

    kernel = functools.partial(
        _dconv_kernel, C=C, O=O, H=H, W=W, KH=KH, KW=KW,
        Ho=Ho, Wo=Wo, stride=stride, padding=padding)

    out_flat = pl.pallas_call(
        kernel,
        out_shape=jax.ShapeDtypeStruct((B, O, S_out), jnp.float32),
        grid_spec=pltpu.PrefetchScalarGridSpec(
            num_scalar_prefetch=0,
            grid=(B,),
            in_specs=[
                pl.BlockSpec((1, C, H, W), lambda b: (b, 0, 0, 0)),
                pl.BlockSpec((O, KH * KW * C), lambda b: (0, 0)),
            ],
            out_specs=pl.BlockSpec((1, O, S_out), lambda b: (b, 0, 0)),
            scratch_shapes=[pltpu.VMEM((C, Hp, Wp), jnp.float32)],
        ),
        compiler_params=pltpu.CompilerParams(
            dimension_semantics=("parallel",)),
    )(x_shuf, w_bf)

    out = out_flat.reshape(B, O, Ho, Wo)
    return out, x_shuf  # also return shuffled input for the reference check


def _reference_conv(x_shuf, weight, stride, padding):
    """Reference conv with the same bf16-operand / f32-accumulate numerics."""
    return jax.lax.conv_general_dilated(
        x_shuf.astype(jnp.bfloat16), weight.astype(jnp.bfloat16),
        window_strides=(stride, stride),
        padding=[(padding, padding), (padding, padding)],
        dimension_numbers=("NCHW", "OIHW", "NCHW"),
        preferred_element_type=jnp.float32,
    )


if __name__ == "__main__":
    # Small shapes consistent with the module: Conv2d(inplane=4, outplane=8, k=3, s=1, p=1)
    B, C, H, W = 2, 4, 16, 16
    O, KH, KW = 8, 3, 3
    stride, padding = 1, 1

    root = jax.random.PRNGKey(0)
    kx, kw, kshuf = jax.random.split(root, 3)

    x = jax.random.normal(kx, (B, C, H, W), dtype=jnp.float32)
    weight = jax.random.normal(kw, (O, C, KH, KW), dtype=jnp.float32) * 0.1

    out, x_shuf = dconv_shuffle_forward(x, weight, kshuf, stride=stride, padding=padding)
    out = jax.block_until_ready(out)

    ref = _reference_conv(x_shuf, weight, stride, padding)
    assert out.shape == (B, O, H, W), out.shape
    max_err = float(jnp.max(jnp.abs(out - ref)))
    assert jnp.allclose(out, ref, atol=2e-2, rtol=2e-2), max_err

    print("KERNEL_OK")
</pallas_src>

<mosaic_0001>
module attributes {stable_mosaic.version = 11 : i64} {
  func.func @_dconv_kernel(%arg0: i32, %arg1: memref<1x4x16x16xf32, #tpu.memory_space<vmem>>, %arg2: memref<8x36xbf16, #tpu.memory_space<vmem>>, %arg3: memref<1x8x256xf32, #tpu.memory_space<vmem>>, %arg4: memref<4x18x18xf32, #tpu.memory_space<vmem>>) attributes {dimension_semantics = [#tpu.dimension_semantics<parallel>], iteration_bounds = array<i64: 2>, scalar_prefetch = 0 : i64, scratch_operands = 1 : i64, tpu.core_type = #tpu.core_type<tc>, window_params = [{transform_indices = @transform_0, window_bounds = array<i64: 1, 4, 16, 16>}, {pipeline_mode = #tpu.pipeline_mode<synchronous>, transform_indices = @transform_1, window_bounds = array<i64: 8, 36>}, {transform_indices = @transform_2, window_bounds = array<i64: 1, 8, 256>}]} {
    %cst = arith.constant 0.000000e+00 : f32
    %0 = vector.broadcast %cst : f32 to vector<4x18x18xf32>
    %c0 = arith.constant 0 : index
    %c0_0 = arith.constant 0 : index
    %c0_1 = arith.constant 0 : index
    %1 = vector.load %arg4[%c0, %c0_0, %c0_1] : memref<4x18x18xf32, #tpu.memory_space<vmem>>, vector<4x18x18xf32>
    tpu.vector_store %arg4[%c0, %c0_0, %c0_1], %0 {strides = array<i32>} : memref<4x18x18xf32, #tpu.memory_space<vmem>>, vector<4x18x18xf32>,
    %c0_2 = arith.constant 0 : index
    %c0_3 = arith.constant 0 : index
    %c0_4 = arith.constant 0 : index
    %c0_5 = arith.constant 0 : index
    %2 = vector.load %arg1[%c0_2, %c0_3, %c0_4, %c0_5] : memref<1x4x16x16xf32, #tpu.memory_space<vmem>>, vector<1x4x16x16xf32>
    %3 = vector.shape_cast %2 : vector<1x4x16x16xf32> to vector<4x16x16xf32>
    %c0_6 = arith.constant 0 : index
    %c1 = arith.constant 1 : index
    %c1_7 = arith.constant 1 : index
    %4 = vector.load %arg4[%c0_6, %c1, %c1_7] : memref<4x18x18xf32, #tpu.memory_space<vmem>>, vector<4x16x16xf32>
    tpu.vector_store %arg4[%c0_6, %c1, %c1_7], %3 {strides = array<i32>} : memref<4x18x18xf32, #tpu.memory_space<vmem>>, vector<4x16x16xf32>,
    %c0_8 = arith.constant 0 : index
    %c0_9 = arith.constant 0 : index
    %c0_10 = arith.constant 0 : index
    %5 = vector.load %arg4[%c0_8, %c0_9, %c0_10] : memref<4x18x18xf32, #tpu.memory_space<vmem>>, vector<4x18x18xf32>
    %6 = vector.extract_strided_slice %5 {offsets = [0, 0, 0], sizes = [4, 16, 16], strides = [1, 1, 1]} : vector<4x18x18xf32> to vector<4x16x16xf32>
    %7 = vector.shape_cast %6 : vector<4x16x16xf32> to vector<4x256xf32>
    %8 = vector.extract_strided_slice %5 {offsets = [0, 0, 1], sizes = [4, 16, 16], strides = [1, 1, 1]} : vector<4x18x18xf32> to vector<4x16x16xf32>
    %9 = vector.shape_cast %8 : vector<4x16x16xf32> to vector<4x256xf32>
    %10 = vector.extract_strided_slice %5 {offsets = [0, 0, 2], sizes = [4, 16, 16], strides = [1, 1, 1]} : vector<4x18x18xf32> to vector<4x16x16xf32>
    %11 = vector.shape_cast %10 : vector<4x16x16xf32> to vector<4x256xf32>
    %12 = vector.extract_strided_slice %5 {offsets = [0, 1, 0], sizes = [4, 16, 16], strides = [1, 1, 1]} : vector<4x18x18xf32> to vector<4x16x16xf32>
    %13 = vector.shape_cast %12 : vector<4x16x16xf32> to vector<4x256xf32>
    %14 = vector.extract_strided_slice %5 {offsets = [0, 1, 1], sizes = [4, 16, 16], strides = [1, 1, 1]} : vector<4x18x18xf32> to vector<4x16x16xf32>
    %15 = vector.shape_cast %14 : vector<4x16x16xf32> to vector<4x256xf32>
    %16 = vector.extract_strided_slice %5 {offsets = [0, 1, 2], sizes = [4, 16, 16], strides = [1, 1, 1]} : vector<4x18x18xf32> to vector<4x16x16xf32>
    %17 = vector.shape_cast %16 : vector<4x16x16xf32> to vector<4x256xf32>
    %18 = vector.extract_strided_slice %5 {offsets = [0, 2, 0], sizes = [4, 16, 16], strides = [1, 1, 1]} : vector<4x18x18xf32> to vector<4x16x16xf32>
    %19 = vector.shape_cast %18 : vector<4x16x16xf32> to vector<4x256xf32>
    %20 = vector.extract_strided_slice %5 {offsets = [0, 2, 1], sizes = [4, 16, 16], strides = [1, 1, 1]} : vector<4x18x18xf32> to vector<4x16x16xf32>
    %21 = vector.shape_cast %20 : vector<4x16x16xf32> to vector<4x256xf32>
    %22 = vector.extract_strided_slice %5 {offsets = [0, 2, 2], sizes = [4, 16, 16], strides = [1, 1, 1]} : vector<4x18x18xf32> to vector<4x16x16xf32>
    %23 = vector.shape_cast %22 : vector<4x16x16xf32> to vector<4x256xf32>
    %24 = tpu.concatenate %7, %9, %11, %13, %15, %17, %19, %21, %23 in 0 : vector<4x256xf32>, vector<4x256xf32>, vector<4x256xf32>, vector<4x256xf32>, vector<4x256xf32>, vector<4x256xf32>, vector<4x256xf32>, vector<4x256xf32>, vector<4x256xf32> -> vector<36x256xf32>
    %25 = arith.truncf %24 : vector<36x256xf32> to vector<36x256xbf16>
    %c0_11 = arith.constant 0 : index
    %c0_12 = arith.constant 0 : index
    %26 = vector.load %arg2[%c0_11, %c0_12] : memref<8x36xbf16, #tpu.memory_space<vmem>>, vector<8x36xbf16>
    %cst_13 = arith.constant dense<0.000000e+00> : vector<8x256xf32>
    %27 = tpu.matmul %26, %25, %cst_13 {dimension_numbers = #tpu.dot_dimension_numbers<[1], [0], [0], [1], [0, 0, 1, 1], [], []>} : vector<8x36xbf16>, vector<36x256xbf16>, vector<8x256xf32> -> vector<8x256xf32>
    %c0_14 = arith.constant 0 : index
    %c0_15 = arith.constant 0 : index
    %c0_16 = arith.constant 0 : index
    %28 = vector.load %arg3[%c0_14, %c0_15, %c0_16] : memref<1x8x256xf32, #tpu.memory_space<vmem>>, vector<1x8x256xf32>
    %29 = vector.shape_cast %28 : vector<1x8x256xf32> to vector<8x256xf32>
    %30 = vector.shape_cast %27 : vector<8x256xf32> to vector<1x8x256xf32>
    tpu.vector_store %arg3[%c0_14, %c0_15, %c0_16], %30 {strides = array<i32>} : memref<1x8x256xf32, #tpu.memory_space<vmem>>, vector<1x8x256xf32>,
    return
  }
  func.func @transform_0(%arg0: i32) -> (i32, i32, i32, i32) {
    %c0_i32 = arith.constant 0 : i32
    %c0_i32_0 = arith.constant 0 : i32
    %c0_i32_1 = arith.constant 0 : i32
    %c0_i32_2 = arith.constant 0 : i32
    return %arg0, %c0_i32, %c0_i32_0, %c0_i32_1 : i32, i32, i32, i32
  }
  func.func @transform_1(%arg0: i32) -> (i32, i32) {
    %c0_i32 = arith.constant 0 : i32
    %c0_i32_0 = arith.constant 0 : i32
    %c0_i32_1 = arith.constant 0 : i32
    return %c0_i32, %c0_i32_0 : i32, i32
  }
  func.func @transform_2(%arg0: i32) -> (i32, i32, i32) {
    %c0_i32 = arith.constant 0 : i32
    %c0_i32_0 = arith.constant 0 : i32
    %c0_i32_1 = arith.constant 0 : i32
    return %arg0, %c0_i32, %c0_i32_0 : i32, i32, i32
  }
}

</mosaic_0001>

<bundles_post_ra>
// kernel: tpu_custom_call.1
= control target key start
LH: loop header
LB: loop body
LE: loop exit
PB: predicated region body
PF: predicated region fallthrough
CT: control target
= control target key end

     0   :  { %7 = vsyncpa [#allocation4], 0  ;;  %s4882_s0 = inlined_call_operand.hbm [shape: f32[2,4,16,16], index: 0, kind: input, shape index: {}]   ;;  %s4883_s1 = inlined_call_operand.hbm [shape: bf16[8,36], index: 1, kind: input, shape index: {}]   ;;  %s4884_s2 = inlined_call_operand.hbm [shape: f32[2,8,256], index: 2, kind: output, shape index: {}]  }
   0x1   :  { %9 = vsyncpa [#allocation4 + $0x1], 0 }
   0x2   :  { %10 = vsyncpa [#allocation7], 0 }
   0x3   :  { %11 = vsyncpa [#allocation5], 0 }
   0x4   :  { %13 = vsyncpa [#allocation5 + $0x1], 0  ;;  %s3095_s9 = smov 0   ;;  %s3097_s10 = smov 0  }
   0x5   :  { %s3099_s11 = smov 0   ;;  %s3101_s12 = smov 0  }
   0x6 LB: > { %s3116_s13 = sadd.s32 4294967295, %s3059_s12   ;;  %s2515_s14 = sadd.s32 4294967294, %s3059_s12   ;;  %s3059_s12 = sphi %s3101_s12, %s4976_s12   ;;  %s3055_s11 = sphi %s3099_s11, %s4975_s11   ;;  %s3051_s10 = sphi %s3097_s10, %s4974_s10   ;;  %s3047_s9 = sphi %s3095_s9, %s4973_s9  }
   0x7   : > { %s3120_s15 = sadd.s32 1, %s3059_s12   ;;  %s26_s16 = sadd.s32 1, %s3055_s11 }
   0x8   : > { %s23_s17 = ssub.s32 %s3059_s12, %s3120_s15  ;;  %p33_p0 = scmp.ne.s32.totalorder %s3055_s11, %s3051_s10 }
   0x9   : > { %p24_p1 = scmp.eq.s32.totalorder %s23_s17, 0  ;;  %p34_p2 = scmp.eq.s32.totalorder %s3059_s12, 0 }
   0xa   : > { %p39_p3 = scmp.ne.s32.totalorder %s3051_s10, %s3047_s9  ;;  %p4885_p4 = scmp.eq.s32.totalorder %s3116_s13, 0 }
   0xb   : > { %s3132_s18 = scalar_select %p24_p1, %s3055_s11, %s26_s16  }
   0xc   : > { %p3134_p5 = por %p34_p2, %p33_p0  ;;  %p3140_p6 = por %p4885_p4, %p39_p3 }
   0xd   : > { %p84_p7 = scmp.eq.s32.totalorder %s3116_s13, 1  ;;  %p90_p8 = scmp.eq.s32.totalorder %s2515_s14, 1 }
   0xe   : > { %s4909_s20 = scalar_select %p3140_p6, 1, 0 }
   0xf   : > { %p2516_p9 = scmp.ge.s32.totalorder %s3059_s12, 1  ;;  %p97_p10 = scmp.lt.s32.totalorder %s3059_s12, 3 }
  0x10   : > { %p3147_p11 = por %p84_p7, %p33_p0  ;;  %p3151_p12 = por %p90_p8, %p39_p3 }
  0x11   : > { %p3155_p13 = pnand %p2516_p9, %p97_p10  ;;  %s3061_s24 = smov [#allocation6]  }
  0x12   : > { %s4910_s21 = scalar_select %p3147_p11, 1, 0 }
  0x13   : > { %s4911_s22 = scalar_select %p3151_p12, 1, 0 }
  0x14   : > { %s4912_s23 = scalar_select %p3155_p13, 1, 0 }
  0x15   : > { %p2543_p2 = pneg %p3155_p13  ;;  %s110_s25 = sshll.u32 %s3061_s24, 4  ;;  %s111_s25 = int_to_ptr.vmem [resolvable:$true] %s110_s25 }
  0x16   : > { %p2556_p4 = scmp.lt.s32.totalorder %s3059_s12, 2  ;;  %p4913_p0 = scmp.eq.s32.totalorder %s3116_s13, 0 }
  0x17   : > { %s121_s27 = sand.u32 1, %s3055_s11   ;;  %s2931_s4 = scalar_lea.hbm %s4883_s1, 64 }
  0x18   : > { %p3165_p7 = pnand %p2543_p2, %p4913_p0  ;;  %p3172_p3 = pnand %p2556_p4, %p3134_p5 }
  0x19   : > { %s2519_s29 = sshll.u32 %s121_s27, 6  ;;  %p2932_p8 = scmp.ne.s32.totalorder %s4883_s1, %s2931_s4 }
  0x1a   : > { %s4915_s28 = scalar_select %p3172_p3, 1, 0 }
  0x1b   : > { %p2933_p9 = pneg %p3165_p7  ;;  %p2938_p4 = scmp.lt.u32.totalorder %s2931_s4, %s4883_s1 }
  0x1d   : > { %p2934_p10 = pnand %p2933_p9, %p2932_p8 }
  0x1f   : > { %p2935_p2 = pneg %p2934_p10 }
  0x21   : > { %p2940_p5 = pnand %p2938_p4, %p2935_p2 }
  0x23   : > { %2943 = shalt.err (!%p2940_p5)
}
  0x24   : > { %s2944_s14 = scalar_lea.vmem %s111_s25, 64  ;;  %p2952_p11 = scmp.lt.s32.totalorder %s111_s25, %s111_s25 }
  0x25   : > { %p2945_p0 = scmp.ne.s32.totalorder %s111_s25, %s2944_s14  ;;  %p2953_p6 = scmp.lt.s32.totalorder %s2944_s14, %s2944_s14 }
  0x27   : > { %p2947_p1 = pnand %p2945_p0, %p2933_p9  ;;  %p2954_p13 = por %p2953_p6, %p2952_p11 }
  0x29   : > { %p2948_p12 = pneg %p2947_p1 }
  0x2b   : > { %p2955_p3 = pnand %p2954_p13, %p2948_p12 }
  0x2d   : > { %2958 = shalt.err (!%p2955_p3)
}
  0x2e   : > { %2546 = dma.hbm_to_vmem [thread:$0]  (!%p3165_p7), %s4883_s1, 64, %s111_s25, [#allocation7]  }
  0x2f   : > { %s2533_s19 = sshll.u32 %s3059_s12, 10  ;;  %s125_s24 = scalar_lea.vmem [#allocation3], %s2519_s29 }
  0x30   : > { %s132_s30 = sshll.u32 %s125_s24, 4  ;;  %s3196_s5 = scalar_lea.hbm %s4882_s0, %s2533_s19  ;;  %s3198_s30 = int_to_ptr.vmem [resolvable:$true] %s132_s30 }
  0x31   : > { %s3200_s26 = scalar_lea.sflag [#allocation4], %s121_s27  ;;  %s2959_s6 = scalar_lea.hbm %s3196_s5, 1024 }
  0x32   : > { %p2960_p6 = scmp.ne.s32.totalorder %s3196_s5, %s2959_s6  ;;  %p4916_p11 = scmp.ne.s32.totalorder %s4915_s28, 0 }
  0x33   : > { %s2964_s7 = scalar_lea.hbm %s4882_s0, 2048  ;;  %p2965_p7 = scmp.lt.u32.totalorder %s3196_s5, %s4882_s0 }
  0x34   : > { %p2961_p12 = pneg %p4916_p11  ;;  %p2966_p3 = scmp.lt.u32.totalorder %s2964_s7, %s2959_s6 }
  0x35   : > { %p2968_p9 = scmp.lt.u32.totalorder %s2959_s6, %s3196_s5 }
  0x36   : > { %p2962_p13 = pnand %p2961_p12, %p2960_p6  ;;  %p2967_p8 = por %p2966_p3, %p2965_p7 }
  0x38   : > { %p2963_p1 = pneg %p2962_p13  ;;  %p2969_p10 = por %p2968_p9, %p2967_p8 }
  0x3a   : > { %p2970_p2 = pnand %p2969_p10, %p2963_p1 }
  0x3c   : > { %2973 = shalt.err (!%p2970_p2)
}
  0x3d   : > { %s2974_s27 = scalar_lea.vmem %s3198_s30, 1024  ;;  %s3062_s16 = smov [#allocation3]  }
  0x3e   : > { %p2975_p4 = scmp.ne.s32.totalorder %s3198_s30, %s2974_s27  ;;  %s2979_s17 = sshll.u32 %s3062_s16, 4  ;;  %s2980_s17 = int_to_ptr.vmem [resolvable:$false] %s2979_s17 }
  0x3f   : > { %s2981_s19 = scalar_lea.vmem %s2980_s17, 2048  ;;  %p2982_p6 = scmp.lt.s32.totalorder %s3198_s30, %s2980_s17 }
  0x40   : > { %p2977_p5 = pnand %p2975_p4, %p2961_p12  ;;  %p2983_p13 = scmp.lt.s32.totalorder %s2981_s19, %s2974_s27 }
  0x42   : > { %p2978_p0 = pneg %p2977_p5  ;;  %p2984_p7 = por %p2983_p13, %p2982_p6 }
  0x44   : > { %p2985_p3 = pnand %p2984_p7, %p2978_p0 }
  0x46   : > { %2988 = shalt.err (!%p2985_p3)
}
  0x47   : > { %s3063_s24 = smov 128   ;;  %s3064_s3 = smov 8  }
  0x48   : > { %2550 = dma.hbm_to_vmem [thread:$0]  (!%p4916_p11), %s3196_s5, 1024, %s3198_s30, %s3200_s26, %s3063_s24, %s3063_s24, %s3064_s3  }
  0x49   : > { %p4917_p12 = scmp.ne.s32.totalorder %s4912_s23, 0 }
  0x4b   : > { %144 = sbr.rel (%p4917_p12) target bundleno = 842 (0x34a), region = 28 }
  0x52   : > { %s3231_s4 = sand.u32 1, %s3051_s10   ;;  %p4918_p1 = scmp.ne.s32.totalorder %s4909_s20, 0 }
  0x53   : > { %s2523_s6 = sshll.u32 %s3231_s4, 6  ;;  %s147_s25 = scalar_lea.sflag [#allocation4], %s3231_s4 }
  0x54   : > { %s3235_s29 = scalar_lea.vmem [#allocation3], %s2523_s6 }
  0x55   : > { %3034 = dma.done.wait (%p4918_p1), %s147_s25, 1024  }
  0x56   : > { %3036 = vsyncadd (%p4918_p1), %s147_s25, 4294966272  ;;  %p4919_p11 = scmp.eq.s32.totalorder %s3116_s13, 0 }
  0x58   : > { %3038 = dma.done.wait (%p4919_p11), [#allocation7], 64   ;;  %p4920_p8 = pmov %p4919_p11 }
  0x59   : > { %vm176_vm0 = vcmask 146432   ;;  %v4890_v0 = vmov 0.0   ;;  %vm179_vm1 = vcmask 140288   ;;  %v192_v1 = vld [vmem:[%s3235_s29 + $0x10] sm:$0xff]  ;;  %v190_v2 = vld [vmem:[%s3235_s29] sm:$0xff]  ;;  %s3066_s20 = smov 1   ;;  %v256_v22 = vlaneseq }
  0x5a   : > { %3040 = vsyncadd (%p4920_p8), [#allocation7], 4294967232  ;;  %181 = vst.msk [vmem:[#allocation2 + $0x18] sm:$0xff] %vm176_vm0, %v4890_v0  ;;  %210 = vrot.lane.b32.xlu1 %v192_v1, %s3066_s20  ;;  %206 = vrot.lane.b32.xlu0 %v190_v2, %s3066_s20  ;;  %v193_v3 = vld [vmem:[%s3235_s29 + $0x18] sm:$0xff]  ;;  %v191_v4 = vld [vmem:[%s3235_s29 + $0x8] sm:$0xff]  ;;  %vm230_vm2 = vcmask 138248  }
  0x5b   : > { %182 = vst.msk [vmem:[#allocation2 + $0x20] sm:$0xff] %vm176_vm0, %v4890_v0  ;;  %177 = vst.msk [vmem:[#allocation2] sm:$0xff] %vm176_vm0, %v4890_v0  ;;  %v195_v5 = vld [vmem:[%s3235_s29 + $0x28] sm:$0xff]  ;;  %v194_v6 = vld [vmem:[%s3235_s29 + $0x20] sm:$0xff]  ;;  %v3067_v20 = vmov 1983009808  }
  0x5c   : > { %178 = vst.msk [vmem:[#allocation2 + $0x8] sm:$0xff] %vm176_vm0, %v4890_v0  ;;  %184 = vst.msk [vmem:[#allocation2 + $0x30] sm:$0xff] %vm176_vm0, %v4890_v0  ;;  %v197_v7 = vld [vmem:[%s3235_s29 + $0x38] sm:$0xff]  ;;  %v196_v8 = vld [vmem:[%s3235_s29 + $0x30] sm:$0xff]  ;;  %v254_v21 = vunpack.c.l.s4 %v3067_v20  ;;  %s3068_s23 = smov 127   ;;  %vm936_vm3 = vcmask 1046528  }
  0x5d   : > { %185 = vst.msk [vmem:[#allocation2 + $0x38] sm:$0xff] %vm176_vm0, %v4890_v0  ;;  %187 = vst.msk [vmem:[#allocation2 + $0x48] sm:$0xff] %vm176_vm0, %v4890_v0  ;;  %v3298_v32 = vshrl.u32 %v256_v22, 7  ;;  %s3069_s28 = smov 126   ;;  %vm1631_vm4 = vcmask 1045504   ;;  %s3071_s30 = smov 32  }
  0x5e   : > { %188 = vst.msk [vmem:[#allocation2 + $0x50] sm:$0xff] %vm176_vm0, %v4890_v0  ;;  %212 = vrot.lane.b32.xlu1 %v193_v3, %s3066_s20  ;;  %208 = vrot.lane.b32.xlu0 %v191_v4, %s3066_s20  ;;  %v255_v29 = vunpack.c.0.s8 %v254_v21  ;;  %s3072_s5 = smov 64   ;;  %s3073_s26 = smov 96   ;;  %vm443_vm5 = vcmask 130048   ;;  %vm445_vm6 = vcmask 261120   ;;  %vm447_vm7 = vcmask 392192  }
  0x5f   : > { %183 = vst.msk [vmem:[#allocation2 + $0x28] sm:$0x3] %vm179_vm1, %v4890_v0  ;;  %180 = vst.msk [vmem:[#allocation2 + $0x10] sm:$0x3] %vm179_vm1, %v4890_v0  ;;  %s3074_s7 = smov 16   ;;  %s3075_s8 = smov 48  }
  0x60   : > { %186 = vst.msk [vmem:[#allocation2 + $0x40] sm:$0x3] %vm179_vm1, %v4890_v0  ;;  %189 = vst.msk [vmem:[#allocation2 + $0x58] sm:$0x3] %vm179_vm1, %v4890_v0  ;;  %v3337_v51 = vsub.s32 %v255_v29, %v3298_v32  ;;  %s3076_s14 = smov 80   ;;  %s3077_s27 = smov 112  }
  0x61   : > { %vm449_vm8 = vcmask 523264   ;;  %vm451_vm9 = vcmask 654336   ;;  %vm453_vm10 = vcmask 785408   ;;  %vm455_vm11 = vcmask 916480   ;;  %s2525_s16 = sshll.u32 %s3231_s4, 4  ;;  %s2534_s24 = sshll.u32 %s3116_s13, 8 }
  0x62   : > { %216 = vrot.lane.b32.xlu1 %v195_v5, %s3066_s20  ;;  %214 = vrot.lane.b32.xlu0 %v194_v6, %s3066_s20  ;;  %vm2350_vm12 = vcmask 1043456   ;;  %vm2370_vm13 = vcmask 1041408   ;;  %vm2366_vm14 = vcmask 293888   ;;  %s174_s17 = scalar_lea.vmem [#allocation8], %s2525_s16  ;;  %s4840_s25 = scalar_lea.hbm %s4884_s2, %s2534_s24 }
  0x63   : > { %s2435_s19 = sshll.u32 %s174_s17, 4  ;;  %s2421_s29 = scalar_lea.sflag [#allocation5], %s3231_s4  ;;  %s4835_s19 = int_to_ptr.vmem [resolvable:$true] %s2435_s19 }
  0x64   : > { %p4970_p10 = scmp.ne.s32.totalorder %s4910_s21, 0  ;;  %s3079_s13 = smov [#allocation8]  }
  0x66   : > { %220 = vrot.lane.b32.xlu1 %v197_v7, %s3066_s20  ;;  %218 = vrot.lane.b32.xlu0 %v196_v8, %s3066_s20  ;;  %s2989_s20 = scalar_lea.vmem %s4835_s19, 256 }
  0x67   : > { %p2990_p9 = scmp.ne.s32.totalorder %s4835_s19, %s2989_s20 }
  0x69   : > { %p2991_p2 = pnand %p2990_p9, %p4970_p10 }
  0x6b   : > { %p2992_p4 = pneg %p2991_p2 }
  0xcc   : > { %v211_v9 = vpop.permute.xlu1 %210  ;;  %v207_v10 = vpop.permute.xlu0 %206 }
  0xcd   : > { %233 = vst.msk [vmem:[#allocation2 + $0x19] sm:$0xff] %vm230_vm2, %v211_v9  ;;  %231 = vst.msk [vmem:[#allocation2 + $0x1] sm:$0xff] %vm230_vm2, %v207_v10 }
  0xd0   : > { %v213_v11 = vpop.permute.xlu1 %212  ;;  %v209_v12 = vpop.permute.xlu0 %208 }
  0xd1   : > { %234 = vst.msk [vmem:[#allocation2 + $0x21] sm:$0xff] %vm230_vm2, %v213_v11  ;;  %232 = vst.msk [vmem:[#allocation2 + $0x9] sm:$0xff] %vm230_vm2, %v209_v12 }
  0xd4   : > { %v217_v13 = vpop.permute.xlu1 %216  ;;  %v215_v14 = vpop.permute.xlu0 %214  ;;  %v3295_v30 = vld [vmem:[#allocation2] sm:$0xff]  ;;  %v3332_v48 = vld [vmem:[#allocation2 + $0x18] sm:$0xff] }
  0xd5   : > { %236 = vst.msk [vmem:[#allocation2 + $0x39] sm:$0xff] %vm230_vm2, %v217_v13  ;;  %235 = vst.msk [vmem:[#allocation2 + $0x31] sm:$0xff] %vm230_vm2, %v215_v14  ;;  %v937_v52 = vrot.slane %v3295_v30, 1  ;;  %v942_v60 = vrot.slane %v3332_v48, 1 }
  0xd8   : > { %v221_v15 = vpop.permute.xlu1 %220  ;;  %v219_v16 = vpop.permute.xlu0 %218  ;;  %v3271_v17 = vld [vmem:[#allocation2 + $0x20] sm:$0xff]  ;;  %v3273_v18 = vld [vmem:[#allocation2 + $0x8] sm:$0xff]  ;;  %v3275_v19 = vld [vmem:[#allocation2 + $0x10] sm:$0x3] }
  0xd9   : > { %238 = vst.msk [vmem:[#allocation2 + $0x51] sm:$0xff] %vm230_vm2, %v221_v15  ;;  %237 = vst.msk [vmem:[#allocation2 + $0x49] sm:$0xff] %vm230_vm2, %v219_v16  ;;  %478 = vrot.lane.b32.xlu1 %v3271_v17, %s3068_s23  ;;  %474 = vrot.lane.b32.xlu0 %v3273_v18, %s3068_s23  ;;  %v938_v23 = vrot.slane %v3273_v18, 1  ;;  %v940_v24 = vrot.slane %v3275_v19, 1  ;;  %v3285_v25 = vld [vmem:[#allocation2 + $0x28] sm:$0x3] }
  0xda   : > { %v943_v31 = vrot.slane %v3271_v17, 1  ;;  %v945_v36 = vrot.slane %v3285_v25, 1 }
  0xdb   : > { %v3303_v35 = vsel %vm936_vm3, %v938_v23, %v940_v24  ;;  %v3355_v59 = vsel %vm936_vm3, %v937_v52, %v938_v23 }
  0xdc   : > { %v3287_v26 = vld [vmem:[#allocation2 + $0x38] sm:$0xff]  ;;  %v3289_v27 = vld [vmem:[#allocation2 + $0x30] sm:$0xff]  ;;  %v3291_v28 = vld [vmem:[#allocation2 + $0x40] sm:$0x3]  ;;  %v3341_v53 = vsel %vm936_vm3, %v943_v31, %v945_v36  ;;  %v3376_v3 = vsel %vm936_vm3, %v942_v60, %v943_v31  ;;  %v1633_v60 = vrot.slane %v3273_v18, 2 }
  0xdd   : > { %482 = vrot.lane.b32.xlu0 %v3287_v26, %s3068_s23  ;;  %v948_v33 = vrot.slane %v3287_v26, 1  ;;  %v950_v34 = vrot.slane %v3291_v28, 1  ;;  %v319_v37 = vcombine.low %v3273_v18, %v3287_v26  ;;  %v252_v38 = vcombine.high %v3295_v30, %v3289_v27 }
  0xde   : > { %v947_v40 = vrot.slane %v3289_v27, 1  ;;  %v251_v41 = vcombine.low %v3295_v30, %v3289_v27  ;;  %v320_v42 = vcombine.high %v3273_v18, %v3287_v26 }
  0xdf   : > { %v3311_v39 = vsel %vm936_vm3, %v948_v33, %v950_v34  ;;  %v3417_v16 = vrot.slane %v319_v37, %v3337_v51  ;;  %v3433_v31 = vrot.slane %v252_v38, %v3337_v51 }
  0xe0   : > { %v3318_v43 = vld [vmem:[#allocation2 + $0x50] sm:$0xff]  ;;  %v3320_v44 = vld [vmem:[#allocation2 + $0x48] sm:$0xff]  ;;  %v1033_v45 = vcombine.low %v3303_v35, %v3311_v39  ;;  %v1034_v46 = vcombine.high %v3303_v35, %v3311_v39  ;;  %v3326_v47 = vld [vmem:[#allocation2 + $0x58] sm:$0x3]  ;;  %v3347_v55 = vsel %vm936_vm3, %v947_v40, %v948_v33  ;;  %v3447_v37 = vrot.slane %v251_v41, %v3337_v51 }
  0xe1   : > { %486 = vrot.lane.b32.xlu1 %v3318_v43, %s3068_s23  ;;  %472 = vrot.lane.b32.xlu0 %v3295_v30, %s3068_s23  ;;  %v953_v49 = vrot.slane %v3318_v43, 1  ;;  %v955_v50 = vrot.slane %v3326_v47, 1  ;;  %v952_v56 = vrot.slane %v3320_v44, 1  ;;  %v965_v61 = vcombine.low %v3355_v59, %v3347_v55 }
  0xe2   : > { %v966_v62 = vcombine.high %v3355_v59, %v3347_v55  ;;  %v3370_v1 = vrot.slane %v1033_v45, %v3337_v51  ;;  %v3398_v10 = vrot.slane %v1034_v46, %v3337_v51  ;;  %v335_v13 = vcombine.low %v3271_v17, %v3318_v43 }
  0xe3   : > { %v3344_v54 = vsel %vm936_vm3, %v953_v49, %v955_v50  ;;  %v3367_v63 = vsel %vm936_vm3, %v952_v56, %v953_v49  ;;  %v3392_v8 = vrot.slane %v965_v61, %v3337_v51  ;;  %v268_v21 = vcombine.high %v3332_v48, %v3320_v44 }
  0xe4   : > { %v1049_v57 = vcombine.low %v3341_v53, %v3344_v54  ;;  %v1050_v58 = vcombine.high %v3341_v53, %v3344_v54  ;;  %v981_v4 = vcombine.low %v3376_v3, %v3367_v63  ;;  %v982_v5 = vcombine.high %v3376_v3, %v3367_v63 }
  0xe5   : > { %476 = vrot.lane.b32.xlu1 %v3332_v48, %s3068_s23  ;;  %480 = vrot.lane.b32.xlu0 %v3289_v27, %s3068_s23  ;;  %v3414_v15 = vrot.slane %v966_v62, %v3337_v51  ;;  %v3420_v20 = vrot.slane %v335_v13, %v3337_v51  ;;  %v267_v23 = vcombine.low %v3332_v48, %v3320_v44  ;;  %v1635_v61 = vrot.slane %v3275_v19, 2 }
  0xe6   : > { %v3373_v2 = vrot.slane %v1049_v57, %v3337_v51  ;;  %v3383_v6 = vrot.slane %v1050_v58, %v3337_v51  ;;  %v3395_v9 = vrot.slane %v981_v4, %v3337_v51  ;;  %v3401_v11 = vrot.slane %v982_v5, %v3337_v51 }
  0xe7   : > { %v352_v22 = vcombine.high %v3417_v16, %v3420_v20  ;;  %v3436_v33 = vrot.slane %v268_v21, %v3337_v51  ;;  %v336_v34 = vcombine.high %v3271_v17, %v3318_v43  ;;  %v3450_v38 = vrot.slane %v267_v23, %v3337_v51 }
  0xe8   : > { %v1066_v7 = vcombine.high %v3370_v1, %v3373_v2  ;;  %v998_v12 = vcombine.high %v3392_v8, %v3395_v9  ;;  %v1081_v14 = vcombine.low %v3398_v10, %v3383_v6  ;;  %v3455_v45 = vrot.slane %v320_v42, %v3337_v51 }
  0xe9   : > { %484 = vrot.lane.b32.xlu1 %v3320_v44, %s3068_s23  ;;  %704 = vrot.lane.b32.xlu0 %v3273_v18, %s3069_s28  ;;  %v299_v40 = vcombine.low %v3433_v31, %v3436_v33  ;;  %v3458_v46 = vrot.slane %v336_v34, %v3337_v51  ;;  %v284_v50 = vcombine.high %v3447_v37, %v3450_v38  ;;  %v1638_v62 = vrot.slane %v3271_v17, 2 }
  0xea   : > { %v3492_v4 = vsel %vm1631_vm4, %v1633_v60, %v1635_v61  ;;  %v1640_v5 = vrot.slane %v3285_v25, 2  ;;  %v1643_v13 = vrot.slane %v3287_v26, 2  ;;  %v1645_v18 = vrot.slane %v3291_v28, 2 }
  0xeb   : > { %v1648_v21 = vrot.slane %v3318_v43, 2  ;;  %v1650_v25 = vrot.slane %v3326_v47, 2  ;;  %v1632_v28 = vrot.slane %v3295_v30, 2  ;;  %v1642_v47 = vrot.slane %v3289_v27, 2 }
  0xec   : > { %v3502_v19 = vsel %vm1631_vm4, %v1638_v62, %v1640_v5  ;;  %v1637_v23 = vrot.slane %v3332_v48, 2 }
  0xed   : > { %708 = vrot.lane.b32.xlu1 %v3271_v17, %s3069_s28  ;;  %712 = vrot.lane.b32.xlu0 %v3287_v26, %s3069_s28  ;;  %v3505_v17 = vsel %vm1631_vm4, %v1643_v13, %v1645_v18  ;;  %v3514_v26 = vsel %vm1631_vm4, %v1648_v21, %v1650_v25  ;;  %v3538_v61 = vsel %vm1631_vm4, %v1642_v47, %v1643_v13 }
  0xee   : > { %v3535_v34 = vsel %vm1631_vm4, %v1637_v23, %v1638_v62 }
  0xf1   : > { %716 = vrot.lane.b32.xlu1 %v3318_v43, %s3069_s28  ;;  %702 = vrot.lane.b32.xlu0 %v3295_v30, %s3069_s28  ;;  %v3526_v43 = vsel %vm1631_vm4, %v1632_v28, %v1633_v60  ;;  %v1647_v30 = vrot.slane %v3320_v44, 2 }
  0xf5   : > { %706 = vrot.lane.b32.xlu1 %v3332_v48, %s3069_s28  ;;  %710 = vrot.lane.b32.xlu0 %v3289_v27, %s3069_s28  ;;  %v3546_v27 = vsel %vm1631_vm4, %v1647_v30, %v1648_v21  ;;  %v3070_v48 = vmov 1934713408  }
  0xf9   : > { %714 = vrot.lane.b32.xlu1 %v3320_v44, %s3069_s28  ;;  %1403 = vrot.lane.b32.xlu0 %v3303_v35, %s3069_s28 }
  0xfd   : > { %1407 = vrot.lane.b32.xlu1 %v3341_v53, %s3069_s28  ;;  %1411 = vrot.lane.b32.xlu0 %v3311_v39, %s3069_s28 }
 0x101   : > { %1415 = vrot.lane.b32.xlu1 %v3344_v54, %s3069_s28  ;;  %1868 = vrot.lane.b32.xlu0 %v3492_v4, %s3068_s23 }
 0x105   : > { %1872 = vrot.lane.b32.xlu1 %v3502_v19, %s3068_s23  ;;  %1876 = vrot.lane.b32.xlu0 %v3505_v17, %s3068_s23 }
 0x109   : > { %1880 = vrot.lane.b32.xlu1 %v3514_v26, %s3068_s23  ;;  %1401 = vrot.lane.b32.xlu0 %v3355_v59, %s3069_s28 }
 0x10d   : > { %1405 = vrot.lane.b32.xlu1 %v3376_v3, %s3069_s28  ;;  %1409 = vrot.lane.b32.xlu0 %v3347_v55, %s3069_s28 }
 0x111   : > { %1413 = vrot.lane.b32.xlu1 %v3367_v63, %s3069_s28  ;;  %1866 = vrot.lane.b32.xlu0 %v3526_v43, %s3068_s23 }
 0x115   : > { %1870 = vrot.lane.b32.xlu1 %v3535_v34, %s3068_s23  ;;  %1874 = vrot.lane.b32.xlu0 %v3538_v61, %s3068_s23 }
 0x119   : > { %1878 = vrot.lane.b32.xlu1 %v3546_v27, %s3068_s23  ;;  %1173 = vrot.lane.b32.xlu0 %v3303_v35, %s3068_s23 }
 0x11d   : > { %1177 = vrot.lane.b32.xlu1 %v3341_v53, %s3068_s23  ;;  %1181 = vrot.lane.b32.xlu0 %v3311_v39, %s3068_s23  ;;  %v286_v53 = vunpack.c.l.s4 %v3070_v48 }
 0x121   : > { %1185 = vrot.lane.b32.xlu1 %v3344_v54, %s3068_s23  ;;  %1171 = vrot.lane.b32.xlu0 %v3355_v59, %s3068_s23 }
 0x125   : > { %1175 = vrot.lane.b32.xlu1 %v3376_v3, %s3068_s23  ;;  %1179 = vrot.lane.b32.xlu0 %v3347_v55, %s3068_s23  ;;  %v287_v3 = vunpack.c.0.s8 %v286_v53 }
 0x127   : > { %v3591_v21 = vsub.s32 %v287_v3, %v3298_v32 }
 0x129   : > { %1183 = vrot.lane.b32.xlu1 %v3367_v63, %s3068_s23  ;;  %2096 = vrot.lane.b32.xlu0 %v3526_v43, %s3069_s28  ;;  %v3600_v47 = vrot.slane %v1066_v7, %v3591_v21  ;;  %s2993_s23 = sshll.u32 %s3079_s13, 4  ;;  %s2994_s23 = int_to_ptr.vmem [resolvable:$false] %s2993_s23 }
 0x12a   : > { %p2996_p5 = scmp.lt.s32.totalorder %s4835_s19, %s2994_s23 }
 0x12d   : > { %2098 = vrot.lane.b32.xlu1 %v3492_v4, %s3069_s28  ;;  %2100 = vrot.lane.b32.xlu0 %v3535_v34, %s3069_s28 }
 0x131   : > { %2102 = vrot.lane.b32.xlu1 %v3502_v19, %s3069_s28  ;;  %2104 = vrot.lane.b32.xlu0 %v3538_v61, %s3069_s28 }
 0x135   : > { %2106 = vrot.lane.b32.xlu1 %v3505_v17, %s3069_s28  ;;  %2108 = vrot.lane.b32.xlu0 %v3546_v27, %s3069_s28 }
 0x139   : > { %2110 = vrot.lane.b32.xlu1 %v3514_v26, %s3069_s28  ;;  %s2995_s28 = scalar_lea.vmem %s2994_s23, 512 }
 0x13a   : > { %p2997_p0 = scmp.lt.s32.totalorder %s2995_s28, %s2989_s20 }
 0x13c   : > { %p2998_p6 = por %p2997_p0, %p2996_p5 }
 0x13e   : > { %p2999_p13 = pnand %p2998_p6, %p2992_p4 }
 0x14b   : > { %v475_v35 = vpop.permute.xlu0 %474  ;;  %v479_v39 = vpop.permute.xlu1 %478 }
 0x14f   : > { %v483_v44 = vpop.permute.xlu0 %482 }
 0x150   : > { %v564_v54 = vcombine.low %v475_v35, %v483_v44  ;;  %v565_v58 = vcombine.high %v475_v35, %v483_v44 }
 0x152   : > { %v3583_v60 = vrot.slane %v564_v54, %v3337_v51  ;;  %v3628_v35 = vrot.slane %v565_v58, %v3337_v51 }
 0x153   : > { %v487_v55 = vpop.permute.xlu1 %486  ;;  %v473_v59 = vpop.permute.xlu0 %472 }
 0x154   : > { %v580_v63 = vcombine.low %v479_v39, %v487_v55 }
 0x156   : > { %v3586_v62 = vrot.slane %v580_v63, %v3337_v51  ;;  %v581_v63 = vcombine.high %v479_v39, %v487_v55 }
 0x157   : > { %v477_v5 = vpop.permute.xlu1 %476  ;;  %v481_v13 = vpop.permute.xlu0 %480 }
 0x158   : > { %v597_v18 = vcombine.high %v3583_v60, %v3586_v62  ;;  %v496_v25 = vcombine.low %v473_v59, %v481_v13  ;;  %v497_v42 = vcombine.high %v473_v59, %v481_v13 }
 0x15a   : > { %v3594_v28 = vrot.slane %v597_v18, %v3591_v21  ;;  %v3605_v54 = vrot.slane %v496_v25, %v3337_v51  ;;  %v3620_v25 = vrot.slane %v998_v12, %v3591_v21 }
 0x15b   : > { %v485_v23 = vpop.permute.xlu1 %484  ;;  %v705_v30 = vpop.permute.xlu0 %704 }
 0x15c   : > { %v512_v48 = vcombine.low %v477_v5, %v485_v23  ;;  %v2608_v53 = vpack.i.bf16 %v3600_v47, %v3594_v28 }
 0x15e   : > { %v3608_v32 = vrot.slane %v512_v48, %v3337_v51  ;;  %2609 = vrot.lane.b32.xlu0 %v2608_v53, %s3071_s30  ;;  %v3623_v48 = vrot.slane %v581_v63, %v3337_v51  ;;  %v513_v63 = vcombine.high %v477_v5, %v485_v23 }
 0x15f   : > { %v709_v3 = vpop.permute.xlu1 %708  ;;  %v713_v18 = vpop.permute.xlu0 %712 }
 0x160   : > { %v529_v7 = vcombine.high %v3605_v54, %v3608_v32  ;;  %v794_v57 = vcombine.low %v705_v30, %v713_v18  ;;  %v612_v12 = vcombine.low %v3628_v35, %v3623_v48  ;;  %v795_v24 = vcombine.high %v705_v30, %v713_v18 }
 0x162   : > { %v3614_v0 = vrot.slane %v529_v7, %v3591_v21  ;;  %v3631_v44 = vrot.slane %v794_v57, %v3337_v51  ;;  %v3645_v57 = vrot.slane %v352_v22, %v3591_v21  ;;  %v3654_v29 = vrot.slane %v612_v12, %v3591_v21 }
 0x163   : > { %v717_v39 = vpop.permute.xlu1 %716  ;;  %v703_v55 = vpop.permute.xlu0 %702  ;;  %v511_v22 = vrot.slane %v497_v42, %v3337_v51 }
 0x164   : > { %v810_v53 = vcombine.low %v709_v3, %v717_v39  ;;  %v2613_v52 = vpack.i.bf16 %v3620_v25, %v3614_v0  ;;  %v811_v59 = vcombine.high %v709_v3, %v717_v39 }
 0x166   : > { %v3634_v7 = vrot.slane %v810_v53, %v3337_v51  ;;  %2614 = vrot.lane.b32.xlu0 %v2613_v52, %s3071_s30  ;;  %v527_v53 = vrot.slane %v513_v63, %v3337_v51 }
 0x167   : > { %v707_v49 = vpop.permute.xlu1 %706  ;;  %v711_v41 = vpop.permute.xlu0 %710 }
 0x168   : > { %v827_v36 = vcombine.high %v3631_v44, %v3634_v7  ;;  %v726_v58 = vcombine.low %v703_v55, %v711_v41  ;;  %v727_v56 = vcombine.high %v703_v55, %v711_v41  ;;  %v544_v42 = vcombine.low %v511_v22, %v527_v53 }
 0x169   : > { %v545_v30 = vcombine.high %v511_v22, %v527_v53  ;;  %v809_v53 = vrot.slane %v795_v24, %v3337_v51 }
 0x16a   : > { %v3648_v52 = vrot.slane %v827_v36, %v3591_v21  ;;  %v3663_v36 = vrot.slane %v1081_v14, %v3591_v21  ;;  %v3666_v63 = vrot.slane %v726_v58, %v3337_v51  ;;  %v741_v12 = vrot.slane %v727_v56, %v3337_v51 }
 0x16b   : > { %v715_v5 = vpop.permute.xlu1 %714  ;;  %v3651_v23 = vpop.permute.xlu0 %1403  ;;  %v825_v14 = vrot.slane %v811_v59, %v3337_v51  ;;  %v3708_v24 = vrot.slane %v545_v30, %v3591_v21 }
 0x16c   : > { %4921 = vst [vmem:[#allocation12_spill] sm:$0xff] %v3651_v23  ;;  %v742_v13 = vcombine.low %v707_v49, %v715_v5  ;;  %v743_v41 = vcombine.high %v707_v49, %v715_v5  ;;  %v2618_v55 = vpack.i.bf16 %v3648_v52, %v3645_v57  ;;  %v2623_v56 = vpack.i.bf16 %v3663_v36, %v3654_v29 }
 0x16d   : > { %v843_v23 = vcombine.high %v809_v53, %v825_v14 }
 0x16e   : > { %v3670_v3 = vrot.slane %v742_v13, %v3337_v51  ;;  %v757_v49 = vrot.slane %v743_v41, %v3337_v51  ;;  %2619 = vrot.lane.b32.xlu1 %v2618_v55, %s3071_s30  ;;  %v3687_v13 = vrot.slane %v299_v40, %v3591_v21  ;;  %v3698_v41 = vrot.slane %v284_v50, %v3591_v21 }
 0x16f   : > { %v3674_v18 = vpop.permute.xlu1 %1407  ;;  %v3676_v39 = vpop.permute.xlu0 %1411 }
 0x170   : > { %4922 = vst [vmem:[#allocation13_spill] sm:$0xff] %v3674_v18  ;;  %4923 = vst [vmem:[#allocation14_spill] sm:$0xff] %v3676_v39  ;;  %v759_v58 = vcombine.high %v3666_v63, %v3670_v3  ;;  %v774_v5 = vcombine.low %v741_v12, %v757_v49 }
 0x172   : > { %2624 = vrot.lane.b32.xlu1 %v2623_v56, %s3072_s5  ;;  %v3692_v59 = vrot.slane %v774_v5, %v3591_v21  ;;  %v3701_v55 = vrot.slane %v759_v58, %v3591_v21  ;;  %v3711_v56 = vrot.slane %v544_v42, %v3591_v21  ;;  %v842_v5 = vcombine.low %v809_v53, %v825_v14 }
 0x173   : > { %v3703_v22 = vpop.permute.xlu1 %1415  ;;  %v3705_v40 = vpop.permute.xlu0 %1868  ;;  %v4926_v58 = vcombine.high %v3414_v15, %v3401_v11  ;;  %v4927_v42 = vcombine.low %v3414_v15, %v3401_v11  ;;  %v596_v14 = vcombine.low %v3583_v60, %v3586_v62  ;;  %v613_v53 = vcombine.high %v3628_v35, %v3623_v48 }
 0x174   : > { %4924 = vst [vmem:[#allocation15_spill] sm:$0xff] %v3692_v59  ;;  %4925 = vst [vmem:[#allocation16_spill] sm:$0xff] %v3705_v40  ;;  %v2648_v39 = vpack.i.bf16 %v3692_v59, %v3687_v13  ;;  %v2628_v50 = vpack.i.bf16 %v3701_v55, %v3698_v41  ;;  %v775_v59 = vcombine.high %v741_v12, %v757_v49 }
 0x175   : > { %v3721_v18 = vrot.slane %v4926_v58, %v3591_v21  ;;  %v3729_v30 = vrot.slane %v4927_v42, %v3591_v21  ;;  %v528_v58 = vcombine.low %v3605_v54, %v3608_v32  ;;  %v3746_v15 = vrot.slane %v843_v23, %v3591_v21 }
 0x176   : > { %2649 = vrot.lane.b32.xlu1 %v2648_v39, %s3072_s5  ;;  %2629 = vrot.lane.b32.xlu0 %v2628_v50, %s3071_s30  ;;  %v3749_v60 = vrot.slane %v842_v5, %v3591_v21  ;;  %v4928_v62 = vcombine.high %v3455_v45, %v3458_v46  ;;  %v4929_v32 = vcombine.low %v3455_v45, %v3458_v46 }
 0x177   : > { %v3737_v40 = vpop.permute.xlu1 %1872  ;;  %v3739_v39 = vpop.permute.xlu0 %1876  ;;  %v2653_v50 = vpack.i.bf16 %v3721_v18, %v3708_v24  ;;  %v2633_v11 = vpack.i.bf16 %v3729_v30, %v3711_v56  ;;  %v826_v35 = vcombine.low %v3631_v44, %v3634_v7  ;;  %v3772_v49 = vrot.slane %v613_v53, %v3591_v21 }
 0x178   : > { %v3757_v54 = vrot.slane %v4928_v62, %v3591_v21  ;;  %v3763_v48 = vrot.slane %v4929_v32, %v3591_v21  ;;  %v3775_v5 = vrot.slane %v528_v58, %v3591_v21  ;;  %v3778_v42 = vrot.slane %v596_v14, %v3591_v21 }
 0x179   : > { %v758_v45 = vcombine.low %v3666_v63, %v3670_v3  ;;  %v3787_v7 = vrot.slane %v775_v59, %v3591_v21  ;;  %v4932_v53 = vcombine.high %v3398_v10, %v3383_v6  ;;  %v4933_v14 = vcombine.low %v3392_v8, %v3395_v9 }
 0x17a   : > { %2654 = vrot.lane.b32.xlu1 %v2653_v50, %s3073_s26  ;;  %2634 = vrot.lane.b32.xlu0 %v2633_v11, %s3072_s5  ;;  %4930 = vst [vmem:[#allocation17_spill] sm:$0xff] %v3775_v5  ;;  %4931 = vst [vmem:[#allocation18_spill] sm:$0xff] %v3778_v42  ;;  %v2658_v46 = vpack.i.bf16 %v3746_v15, %v3757_v54  ;;  %v2638_v44 = vpack.i.bf16 %v3749_v60, %v3763_v48  ;;  %v4938_v11 = vmov 0.0  }
 0x17b   : > { %v3767_v23 = vpop.permute.xlu1 %1880  ;;  %v3769_v12 = vpop.permute.xlu0 %1401  ;;  %v3793_v58 = vrot.slane %v4932_v53, %v3591_v21  ;;  %v3799_v63 = vrot.slane %v4933_v14, %v3591_v21  ;;  %v4935_v3 = vcombine.high %v3433_v31, %v3436_v33  ;;  %v4936_v6 = vcombine.low %v3370_v1, %v3373_v2 }
 0x17c   : > { %v628_v62 = vcombine.high %v3778_v42, %v4938_v11  ;;  %v3824_v31 = vrot.slane %v758_v45, %v3591_v21  ;;  %v560_v1 = vcombine.high %v3775_v5, %v4938_v11  ;;  %v3831_v2 = vrot.slane %v826_v35, %v3591_v21  ;;  %v4949_v5 = vld [vmem:[#allocation16_spill] sm:$0xff] }
 0x17d   : > { %4934 = vst [vmem:[#allocation19_spill] sm:$0xff] %v3799_v63  ;;  %v3807_v59 = vrot.slane %v4935_v3, %v3591_v21  ;;  %v3813_v10 = vrot.slane %v4936_v6, %v3591_v21  ;;  %v2643_v9 = vpack.i.bf16 %v3793_v58, %v3772_v49  ;;  %v1029_v32 = vcombine.high %v3799_v63, %v4938_v11 }
 0x17e   : > { %2659 = vrot.lane.b32.xlu1 %v2658_v46, %s3073_s26  ;;  %2639 = vrot.lane.b32.xlu0 %v2638_v44, %s3072_s5  ;;  %4939 = vst [vmem:[#allocation21_spill] sm:$0xff] %v3824_v31  ;;  %4940 = vst [vmem:[#allocation22_spill] sm:$0xff] %v3831_v2  ;;  %v4941_v46 = vcombine.low %v3417_v16, %v3420_v20  ;;  %v4943_v35 = vcombine.low %v3447_v37, %v3450_v38 }
 0x17f   : > { %4937 = vst [vmem:[#allocation20_spill] sm:$0xff] %v3813_v10  ;;  %v3815_v50 = vpop.permute.xlu1 %1405  ;;  %v3817_v8 = vpop.permute.xlu0 %1409  ;;  %v2663_v33 = vpack.i.bf16 %v3787_v7, %v3807_v59  ;;  %v1097_v45 = vcombine.high %v3813_v10, %v4938_v11  ;;  %v2673_v6 = vpack.i.bf16 %v1029_v32, %v560_v1  ;;  %v790_v16 = vcombine.high %v3824_v31, %v4938_v11 }
 0x180   : > { %v3843_v44 = vrot.slane %v4941_v46, %v3591_v21  ;;  %v3849_v53 = vrot.slane %v4943_v35, %v3591_v21  ;;  %v1728_v38 = vcombine.low %v3492_v4, %v3505_v17  ;;  %v1744_v1 = vcombine.low %v3502_v19, %v3514_v26 }
 0x181   : > { %v1958_v63 = vcombine.low %v4949_v5, %v3739_v39 }
 0x182   : > { %2664 = vrot.lane.b32.xlu1 %v2663_v33, %s3073_s26  ;;  %2644 = vrot.lane.b32.xlu0 %v2643_v9, %s3073_s26  ;;  %4942 = vst [vmem:[#allocation23_spill] sm:$0xff] %v3843_v44  ;;  %4944 = vst [vmem:[#allocation24_spill] sm:$0xff] %v3849_v53  ;;  %v2668_v9 = vpack.i.bf16 %v1097_v45, %v628_v62  ;;  %v858_v33 = vcombine.high %v3831_v2, %v4938_v11 }
 0x183   : > { %v3851_v14 = vpop.permute.xlu1 %1413  ;;  %v3853_v3 = vpop.permute.xlu0 %1866  ;;  %v383_v20 = vcombine.high %v3843_v44, %v4938_v11  ;;  %v315_v37 = vcombine.high %v3849_v53, %v4938_v11  ;;  %v1729_v62 = vcombine.high %v3492_v4, %v3505_v17  ;;  %v1745_v53 = vcombine.high %v3502_v19, %v3514_v26  ;;  %v4948_v44 = vld [vmem:[#allocation15_spill] sm:$0xff] }
 0x184   : > { %v1676_v4 = vcombine.low %v3535_v34, %v3546_v27  ;;  %v1660_v17 = vcombine.low %v3526_v43, %v3538_v61  ;;  %v3898_v26 = vrot.slane %v1744_v1, %v3337_v51  ;;  %v631_v1 = vcombine.high %v3772_v49, %v4938_v11 }
 0x185   : > { %v2678_v46 = vpack.i.bf16 %v858_v33, %v383_v20  ;;  %v2688_v35 = vpack.i.bf16 %v790_v16, %v315_v37  ;;  %v1098_v33 = vcombine.high %v3600_v47, %v4938_v11  ;;  %v3895_v19 = vrot.slane %v1729_v62, %v3337_v51  ;;  %v4946_v62 = vld [vmem:[#allocation14_spill] sm:$0xff] }
 0x186   : > { %2674 = vrot.lane.b32.xlu1 %v2673_v6, %s3074_s7  ;;  %2669 = vrot.lane.b32.xlu0 %v2668_v9, %s3074_s7  ;;  %v629_v6 = vcombine.high %v3594_v28, %v4938_v11  ;;  %v561_v9 = vcombine.high %v3614_v0, %v4938_v11  ;;  %v1030_v28 = vcombine.high %v3620_v25, %v4938_v11 }
 0x187   : > { %v3871_v32 = vpop.permute.xlu1 %1870  ;;  %v3873_v45 = vpop.permute.xlu0 %1874  ;;  %v3892_v0 = vrot.slane %v1728_v38, %v3337_v51  ;;  %v859_v47 = vcombine.high %v3648_v52, %v4938_v11  ;;  %v860_v25 = vcombine.high %v3749_v60, %v4938_v11  ;;  %v3909_v38 = vrot.slane %v1745_v53, %v3337_v51 }
 0x188   : > { %v2683_v37 = vpack.i.bf16 %v1098_v33, %v629_v6  ;;  %v3919_v6 = vrot.slane %v1660_v17, %v3337_v51  ;;  %v384_v52 = vcombine.high %v3645_v57, %v4938_v11  ;;  %v385_v60 = vcombine.high %v3763_v48, %v4938_v11  ;;  %v4945_v57 = vld [vmem:[#allocation13_spill] sm:$0xff] }
 0x189   : > { %v1099_v17 = vcombine.high %v3663_v36, %v4938_v11  ;;  %v1100_v33 = vcombine.high %v3793_v58, %v4938_v11  ;;  %v3947_v36 = vcombine.high %v3711_v56, %v4938_v11  ;;  %v3951_v58 = vcombine.high %v3729_v30, %v4938_v11 }
 0x18a   : > { %2679 = vrot.lane.b32.xlu1 %v2678_v46, %s3074_s7  ;;  %2689 = vrot.lane.b32.xlu0 %v2688_v35, %s3074_s7  ;;  %v2693_v46 = vpack.i.bf16 %v1030_v28, %v561_v9  ;;  %v3916_v35 = vrot.slane %v1676_v4, %v3337_v51  ;;  %v630_v4 = vcombine.high %v3654_v29, %v4938_v11 }
 0x18b   : > { %v3900_v16 = vpop.permute.xlu1 %1878  ;;  %v3902_v20 = vpop.permute.xlu0 %1173  ;;  %v316_v28 = vcombine.high %v3698_v41, %v4938_v11  ;;  %v2698_v48 = vpack.i.bf16 %v859_v47, %v384_v52  ;;  %v317_v29 = vcombine.high %v3687_v13, %v4938_v11  ;;  %v4947_v47 = vld [vmem:[#allocation12_spill] sm:$0xff]  ;;  %v563_v13 = vcombine.high %v3708_v24, %v4938_v11 }
 0x18c   : > { %v1693_v41 = vcombine.high %v3919_v6, %v3916_v35  ;;  %v1032_v56 = vcombine.high %v3721_v18, %v4938_v11  ;;  %v1974_v30 = vcombine.low %v3737_v40, %v3767_v23  ;;  %v3977_v24 = vcombine.high %v3746_v15, %v4938_v11 }
 0x18d   : > { %v2723_v31 = vpack.i.bf16 %v1100_v33, %v631_v1  ;;  %v792_v2 = vcombine.high %v4948_v44, %v4938_v11  ;;  %v793_v1 = vcombine.high %v3787_v7, %v4938_v11  ;;  %v4952_v42 = vcombine.high %v4945_v57, %v3703_v22 }
 0x18e   : > { %2684 = vrot.lane.b32.xlu1 %v2683_v37, %s3075_s8  ;;  %2694 = vrot.lane.b32.xlu0 %v2693_v46, %s3075_s8  ;;  %v1509_v37 = vcombine.low %v4945_v57, %v3703_v22  ;;  %v2718_v46 = vpack.i.bf16 %v860_v25, %v385_v60  ;;  %v1493_v25 = vcombine.low %v4947_v47, %v4946_v62 }
 0x18f   : > { %v3927_v53 = vpop.permute.xlu1 %1177  ;;  %v3929_v9 = vpop.permute.xlu0 %1181  ;;  %v791_v60 = vcombine.high %v3701_v55, %v4938_v11  ;;  %v2713_v55 = vpack.i.bf16 %v3951_v58, %v3947_v36  ;;  %v3993_v15 = vrot.slane %v1693_v41, %v3591_v21  ;;  %v2733_v44 = vpack.i.bf16 %v1032_v56, %v563_v13 }
 0x190   : > { %v3980_v18 = vrot.slane %v1509_v37, %v3337_v51  ;;  %v3996_v37 = vrot.slane %v1493_v25, %v3337_v51  ;;  %v1907_v41 = vcombine.high %v3871_v32, %v3900_v16  ;;  %v2728_v25 = vpack.i.bf16 %v792_v2, %v317_v29 }
 0x191   : > { %4950 = vst [vmem:[#allocation13_spill] sm:$0xff] %v3993_v15  ;;  %v2708_v36 = vpack.i.bf16 %v791_v60, %v316_v28  ;;  %v4020_v13 = vrot.slane %v1958_v63, %v3337_v51  ;;  %v1442_v56 = vcombine.high %v3815_v50, %v3851_v14  ;;  %v1891_v28 = vcombine.high %v3853_v3, %v3873_v45 }
 0x192   : > { %2699 = vrot.lane.b32.xlu1 %v2698_v48, %s3075_s8  ;;  %2719 = vrot.lane.b32.xlu0 %v2718_v46, %s3076_s14  ;;  %v3973_v48 = vcombine.high %v3807_v59, %v4938_v11  ;;  %v2703_v46 = vpack.i.bf16 %v1099_v17, %v630_v4  ;;  %v3990_v59 = vcombine.high %v3757_v54, %v4938_v11 }
 0x193   : > { %v3965_v49 = vpop.permute.xlu1 %1185  ;;  %v3967_v52 = vpop.permute.xlu0 %1171  ;;  %v4005_v54 = vrot.slane %v1974_v30, %v3337_v51  ;;  %v1906_v30 = vcombine.low %v3871_v32, %v3900_v16  ;;  %v1975_v60 = vcombine.high %v3737_v40, %v3767_v23  ;;  %v1425_v29 = vcombine.low %v3769_v12, %v3817_v8 }
 0x194   : > { %v2738_v58 = vpack.i.bf16 %v3977_v24, %v3990_v59  ;;  %v2743_v63 = vpack.i.bf16 %v793_v1, %v3973_v48  ;;  %v1441_v32 = vcombine.low %v3815_v50, %v3851_v14  ;;  %v1890_v40 = vcombine.low %v3853_v3, %v3873_v45 }
 0x195   : > { %v1991_v2 = vcombine.high %v4020_v13, %v4005_v54  ;;  %v4050_v48 = vrot.slane %v1907_v41, %v3337_v51  ;;  %v1280_v59 = vcombine.high %v3927_v53, %v3965_v49  ;;  %v4057_v50 = vrot.slane %v1442_v56, %v3337_v51 }
 0x196   : > { %2704 = vrot.lane.b32.xlu1 %v2703_v46, %s3076_s14  ;;  %2724 = vrot.lane.b32.xlu0 %v2723_v31, %s3077_s27  ;;  %v1526_v31 = vcombine.high %v3996_v37, %v3980_v18  ;;  %v1426_v46 = vcombine.high %v3769_v12, %v3817_v8  ;;  %v4060_v14 = vrot.slane %v1891_v28, %v3337_v51 }
 0x197   : > { %v4007_v17 = vpop.permute.xlu1 %1175  ;;  %v4009_v33 = vpop.permute.xlu0 %1179  ;;  %v4063_v3 = vrot.slane %v1906_v30, %v3337_v51  ;;  %v1279_v12 = vcombine.low %v3927_v53, %v3965_v49  ;;  %v1264_v8 = vcombine.high %v3902_v20, %v3929_v9  ;;  %v4078_v41 = vrot.slane %v1441_v32, %v3337_v51 }
 0x198   : > { %v1195_v24 = vcombine.low %v3967_v52, %v4009_v33  ;;  %v1263_v53 = vcombine.low %v3902_v20, %v3929_v9  ;;  %v4090_v28 = vrot.slane %v1991_v2, %v3591_v21  ;;  %v4098_v30 = vrot.slane %v1280_v59, %v3337_v51 }
 0x199   : > { %v4103_v20 = vrot.slane %v1425_v29, %v3337_v51  ;;  %v4108_v2 = vrot.slane %v1279_v12, %v3337_v51  ;;  %v4111_v32 = vrot.slane %v1526_v31, %v3591_v21  ;;  %v1494_v59 = vcombine.high %v4947_v47, %v4946_v62 }
 0x19a   : > { %2709 = vrot.lane.b32.xlu1 %v2708_v36, %s3075_s8  ;;  %2729 = vrot.lane.b32.xlu0 %v2728_v25, %s3076_s14  ;;  %v4070_v45 = vrot.slane %v1195_v24, %v3337_v51  ;;  %v4081_v25 = vrot.slane %v1890_v40, %v3337_v51  ;;  %v4129_v12 = vrot.slane %v1263_v53, %v3337_v51 }
 0x19b   : > { %v4043_v23 = vpop.permute.xlu1 %1183  ;;  %v4045_v16 = vpop.permute.xlu0 %2096  ;;  %v1458_v31 = vcombine.high %v4103_v20, %v4078_v41  ;;  %v2748_v62 = vpack.i.bf16 %v4090_v28, %v4111_v32  ;;  %v1776_v4 = vcombine.low %v3895_v19, %v3909_v38  ;;  %v1524_v10 = vrot.slane %v4952_v42, %v3337_v51 }
 0x19c   : > { %v1211_v1 = vcombine.low %v4007_v17, %v4043_v23  ;;  %v1923_v9 = vcombine.high %v4081_v25, %v4063_v3  ;;  %v1212_v53 = vcombine.high %v4007_v17, %v4043_v23  ;;  %v4955_v23 = vcombine.high %v3526_v43, %v3538_v61 }
 0x19d   : > { %v1196_v22 = vcombine.high %v3967_v52, %v4009_v33  ;;  %v1761_v57 = vcombine.high %v3892_v0, %v3898_v26 }
 0x19e   : > { %v4073_v36 = vrot.slane %v1211_v1, %v3337_v51  ;;  %2714 = vrot.lane.b32.xlu1 %v2713_v55, %s3076_s14  ;;  %2734 = vrot.lane.b32.xlu0 %v2733_v44, %s3077_s27  ;;  %v4093_v55 = vrot.slane %v1426_v46, %v3337_v51  ;;  %v1938_v44 = vcombine.low %v4060_v14, %v4050_v48 }
 0x19f   : > { %v4085_v49 = vpop.permute.xlu1 %2098  ;;  %v4087_v56 = vpop.permute.xlu0 %2100  ;;  %v4116_v46 = vrot.slane %v1264_v8, %v3337_v51  ;;  %v1989_v1 = vrot.slane %v1975_v60, %v3337_v51  ;;  %v1296_v60 = vcombine.high %v4129_v12, %v4108_v2  ;;  %v4190_v33 = vrot.slane %v1212_v53, %v3337_v51 }
 0x1a0   : > { %v1228_v24 = vcombine.high %v4070_v45, %v4073_v36  ;;  %v1473_v40 = vcombine.low %v4093_v55, %v4057_v50  ;;  %v4142_v47 = vrot.slane %v1938_v44, %v3591_v21  ;;  %v4953_v44 = vcombine.high %v4949_v5, %v3739_v39 }
 0x1a1   : > { %v4179_v5 = vrot.slane %v1458_v31, %v3591_v21  ;;  %v4210_v53 = vrot.slane %v1196_v22, %v3337_v51 }
 0x1a2   : > { %2744 = vrot.lane.b32.xlu1 %v2743_v63, %s3077_s27  ;;  %2739 = vrot.lane.b32.xlu0 %v2738_v58, %s3077_s27  ;;  %v4121_v29 = vrot.slane %v1228_v24, %v3591_v21  ;;  %v1311_v58 = vcombine.low %v4116_v46, %v4098_v30  ;;  %4951 = vst [vmem:[#allocation14_spill] sm:$0xff] %v4142_v47 }
 0x1a3   : > { %v4131_v8 = vpop.permute.xlu1 %2102  ;;  %v4133_v7 = vpop.permute.xlu0 %2104  ;;  %v4149_v24 = vrot.slane %v1923_v9, %v3591_v21  ;;  %v4164_v17 = vrot.slane %v1473_v40, %v3591_v21  ;;  %v4170_v9 = vrot.slane %v4955_v23, %v3337_v51  ;;  %v1508_v40 = vrot.slane %v1494_v59, %v3337_v51 }
 0x1a4   : > { %v2768_v63 = vpack.i.bf16 %v3993_v15, %v4121_v29  ;;  %v1973_v15 = vrot.slane %v4953_v44, %v3337_v51  ;;  %v4187_v61 = vrot.slane %v1311_v58, %v3591_v21  ;;  %v4956_v59 = vcombine.high %v3535_v34, %v3546_v27 }
 0x1a5   : > { %4954 = vst [vmem:[#allocation12_spill] sm:$0xff] %v4164_v17  ;;  %v2773_v43 = vpack.i.bf16 %v4142_v47, %v4164_v17  ;;  %v2753_v31 = vpack.i.bf16 %v4149_v24, %v4179_v5  ;;  %v1542_v23 = vcombine.high %v1508_v40, %v1524_v10  ;;  %v4216_v27 = vrot.slane %v1761_v57, %v3591_v21 }
 0x1a6   : > { %2769 = vrot.lane.b32.xlu1 %v2768_v63, %s3071_s30  ;;  %2749 = vrot.lane.b32.xlu0 %v2748_v62, %s3071_s30  ;;  %v2007_v63 = vcombine.high %v1973_v15, %v1989_v1  ;;  %v2006_v52 = vcombine.low %v1973_v15, %v1989_v1  ;;  %v4195_v62 = vrot.slane %v1296_v60, %v3591_v21 }
 0x1a7   : > { %v4174_v42 = vpop.permute.xlu1 %2106  ;;  %v4176_v39 = vpop.permute.xlu0 %2108  ;;  %v4201_v44 = vrot.slane %v4956_v59, %v3337_v51  ;;  %v4207_v15 = vrot.slane %v1776_v4, %v3591_v21  ;;  %v1541_v1 = vcombine.low %v1508_v40, %v1524_v10  ;;  %v1312_v59 = vcombine.high %v4116_v46, %v4098_v30 }
 0x1a8   : > { %v2137_v58 = vcombine.high %v4087_v56, %v4176_v39  ;;  %v2189_v60 = vcombine.high %v4085_v49, %v4174_v42  ;;  %v2121_v4 = vcombine.high %v4045_v16, %v4133_v7  ;;  %v4225_v22 = vrot.slane %v2007_v63, %v3591_v21 }
 0x1a9   : > { %v2778_v10 = vpack.i.bf16 %v4207_v15, %v4187_v61  ;;  %v1243_v40 = vcombine.low %v4210_v53, %v4190_v33  ;;  %v2758_v57 = vpack.i.bf16 %v4216_v27, %v4195_v62  ;;  %v4240_v46 = vrot.slane %v1542_v23, %v3591_v21 }
 0x1aa   : > { %2774 = vrot.lane.b32.xlu1 %v2773_v43, %s3072_s5  ;;  %2754 = vrot.lane.b32.xlu0 %v2753_v31, %s3071_s30  ;;  %v4233_v31 = vrot.slane %v2006_v52, %v3591_v21  ;;  %v4236_v30 = vrot.slane %v2137_v58, %v3337_v51  ;;  %v1777_v63 = vcombine.high %v3895_v19, %v3909_v38 }
 0x1ab   : > { %v2111_v34 = vpop.permute.xlu1 %2110  ;;  %v1708_v17 = vcombine.low %v4170_v9, %v4201_v44  ;;  %v1922_v47 = vcombine.low %v4081_v25, %v4063_v3  ;;  %v4249_v52 = vrot.slane %v2189_v60, %v3337_v51  ;;  %v4256_v23 = vrot.slane %v1541_v1, %v3591_v21 }
 0x1ac   : > { %v2205_v43 = vcombine.high %v4131_v8, %v2111_v34  ;;  %v1939_v19 = vcombine.high %v4060_v14, %v4050_v48  ;;  %v4261_v38 = vrot.slane %v2121_v4, %v3337_v51  ;;  %v2783_v3 = vpack.i.bf16 %v4225_v22, %v4240_v46 }
 0x1ad   : > { %v4266_v25 = vrot.slane %v1312_v59, %v3591_v21  ;;  %v2204_v60 = vcombine.low %v4131_v8, %v2111_v34  ;;  %v2763_v1 = vpack.i.bf16 %v4233_v31, %v4256_v23  ;;  %v1457_v48 = vcombine.low %v4103_v20, %v4078_v41 }
 0x1ae   : > { %2779 = vrot.lane.b32.xlu1 %v2778_v10, %s3072_s5  ;;  %v4252_v58 = vrot.slane %v2205_v43, %v3337_v51  ;;  %2759 = vrot.lane.b32.xlu0 %v2758_v57, %s3071_s30  ;;  %v4274_v43 = vrot.slane %v1243_v40, %v3591_v21  ;;  %v2168_v14 = vcombine.low %v4261_v38, %v4236_v30 }
 0x1af   : > { %v4282_v59 = vrot.slane %v1777_v63, %v3591_v21  ;;  %v4285_v8 = vrot.slane %v1708_v17, %v3591_v21  ;;  %v1474_v34 = vcombine.high %v4093_v55, %v4057_v50  ;;  %v4290_v4 = vrot.slane %v1922_v47, %v3591_v21 }
 0x1b0   : > { %v2236_v10 = vcombine.low %v4249_v52, %v4252_v58  ;;  %v2188_v41 = vcombine.low %v4085_v49, %v4174_v42  ;;  %v2136_v20 = vcombine.low %v4087_v56, %v4176_v39  ;;  %v1295_v40 = vcombine.low %v4129_v12, %v4108_v2 }
 0x1b1   : > { %v2798_v17 = vpack.i.bf16 %v4282_v59, %v4266_v25  ;;  %v4305_v50 = vrot.slane %v1939_v19, %v3591_v21  ;;  %v1244_v49 = vcombine.high %v4210_v53, %v4190_v33  ;;  %v2120_v56 = vcombine.low %v4045_v16, %v4133_v7 }
 0x1b2   : > { %2784 = vrot.lane.b32.xlu1 %v2783_v3, %s3073_s26  ;;  %2764 = vrot.lane.b32.xlu0 %v2763_v1, %s3072_s5  ;;  %v4302_v57 = vrot.slane %v2236_v10, %v3591_v21  ;;  %v4312_v55 = vrot.slane %v2204_v60, %v3337_v51  ;;  %v2788_v2 = vpack.i.bf16 %v4285_v8, %v4274_v43 }
 0x1b3   : > { %v1760_v12 = vcombine.low %v3892_v0, %v3898_v26  ;;  %v4319_v47 = vrot.slane %v1457_v48, %v3591_v21  ;;  %v4323_v42 = vrot.slane %v2168_v14, %v3591_v21  ;;  %v4326_v39 = vrot.slane %v2188_v41, %v3337_v51 }
 0x1b4   : > { %v4329_v7 = vrot.slane %v2136_v20, %v3337_v51  ;;  %v4333_v16 = vrot.slane %v1474_v34, %v3591_v21  ;;  %v1709_v0 = vcombine.high %v4170_v9, %v4201_v44  ;;  %v1990_v26 = vcombine.low %v4020_v13, %v4005_v54 }
 0x1b5   : > { %v4340_v33 = vrot.slane %v1295_v40, %v3591_v21  ;;  %v2813_v53 = vpack.i.bf16 %v4302_v57, %v4323_v42  ;;  %v1954_v63 = vcombine.high %v4290_v4, %v4938_v11  ;;  %v4347_v19 = vrot.slane %v2120_v56, %v3337_v51 }
 0x1b6   : > { %2799 = vrot.lane.b32.xlu1 %v2798_v17, %s3073_s26  ;;  %2789 = vrot.lane.b32.xlu0 %v2788_v2, %s3072_s5  ;;  %v2221_v3 = vcombine.high %v4326_v39, %v4312_v55  ;;  %v2793_v9 = vpack.i.bf16 %v4305_v50, %v4333_v16  ;;  %v4354_v54 = vrot.slane %v1244_v49, %v3591_v21 }
 0x1b7   : > { %v1489_v13 = vcombine.high %v4319_v47, %v4938_v11  ;;  %v4360_v44 = vrot.slane %v1760_v12, %v3591_v21  ;;  %v1525_v51 = vcombine.low %v3996_v37, %v3980_v18  ;;  %v2153_v60 = vcombine.high %v4347_v19, %v4329_v7 }
 0x1b8   : > { %v4368_v10 = vrot.slane %v1709_v0, %v3591_v21  ;;  %v1227_v1 = vcombine.low %v4070_v45, %v4073_v36  ;;  %v1327_v14 = vcombine.high %v4340_v33, %v4938_v11  ;;  %v4375_v34 = vrot.slane %v1990_v26, %v3591_v21 }
 0x1b9   : > { %v2823_v48 = vpack.i.bf16 %v1954_v63, %v1489_v13  ;;  %v4378_v18 = vrot.slane %v2221_v3, %v3591_v21  ;;  %v1692_v41 = vcombine.low %v3919_v6, %v3916_v35  ;;  %v1792_v45 = vcombine.high %v4360_v44, %v4938_v11 }
 0x1ba   : > { %2814 = vrot.lane.b32.xlu1 %v2813_v53, %s3072_s5  ;;  %2794 = vrot.lane.b32.xlu0 %v2793_v9, %s3073_s26  ;;  %v2803_v37 = vpack.i.bf16 %v4368_v10, %v4354_v54  ;;  %v4388_v36 = vrot.slane %v1525_v51, %v3591_v21  ;;  %v4391_v20 = vrot.slane %v2153_v60, %v3591_v21 }
 0x1bb   : > { %v4395_v40 = vrot.slane %v1227_v1, %v3591_v21  ;;  %v2023_v17 = vcombine.high %v4090_v28, %v4938_v11  ;;  %v2828_v35 = vpack.i.bf16 %v1792_v45, %v1327_v14  ;;  %v2022_v49 = vcombine.high %v4375_v34, %v4938_v11  ;;  %v4959_v45 = vld [vmem:[#allocation12_spill] sm:$0xff] }
 0x1bc   : > { %v2808_v6 = vpack.i.bf16 %v4378_v18, %v4391_v20  ;;  %v1558_v56 = vcombine.high %v4111_v32, %v4938_v11  ;;  %v4407_v2 = vrot.slane %v1692_v41, %v3591_v21  ;;  %v1557_v28 = vcombine.high %v4388_v36, %v4938_v11 }
 0x1bd   : > { %v1259_v0 = vcombine.high %v4395_v40, %v4938_v11  ;;  %v1328_v26 = vcombine.high %v4195_v62, %v4938_v11  ;;  %v1793_v63 = vcombine.high %v4216_v27, %v4938_v11  ;;  %v1955_v3 = vcombine.high %v4149_v24, %v4938_v11 }
 0x1be   : > { %2824 = vrot.lane.b32.xlu1 %v2823_v48, %s3074_s7  ;;  %2804 = vrot.lane.b32.xlu0 %v2803_v37, %s3073_s26  ;;  %v2833_v12 = vpack.i.bf16 %v2023_v17, %v1558_v56  ;;  %v2818_v53 = vpack.i.bf16 %v2022_v49, %v1557_v28  ;;  %v1724_v32 = vcombine.high %v4407_v2, %v4938_v11 }
 0x1bf   : > { %v2024_v13 = vcombine.high %v4233_v31, %v4938_v11  ;;  %v2848_v51 = vpack.i.bf16 %v1793_v63, %v1328_v26  ;;  %v1490_v62 = vcombine.high %v4179_v5, %v4938_v11  ;;  %v1559_v60 = vcombine.high %v4256_v23, %v4938_v11  ;;  %v4957_v23 = vld [vmem:[#allocation13_spill] sm:$0xff] }
 0x1c0   : > { %v2838_v9 = vpack.i.bf16 %v1724_v32, %v1259_v0  ;;  %v2220_v27 = vcombine.low %v4326_v39, %v4312_v55  ;;  %v1329_v24 = vcombine.high %v4187_v61, %v4938_v11  ;;  %v1260_v31 = vcombine.high %v4121_v29, %v4938_v11  ;;  %v4958_v39 = vld [vmem:[#allocation14_spill] sm:$0xff] }
 0x1c1   : > { %v2843_v1 = vpack.i.bf16 %v1955_v3, %v1490_v62  ;;  %v2853_v48 = vpack.i.bf16 %v2024_v13, %v1559_v60  ;;  %v2152_v5 = vcombine.low %v4347_v19, %v4329_v7  ;;  %v1794_v14 = vcombine.high %v4207_v15, %v4938_v11 }
 0x1c2   : > { %2829 = vrot.lane.b32.xlu1 %v2828_v35, %s3074_s7  ;;  %2809 = vrot.lane.b32.xlu0 %v2808_v6, %s3071_s30  ;;  %v1725_v37 = vcombine.high %v4957_v23, %v4938_v11  ;;  %v4447_v61 = vrot.slane %v2220_v27, %v3591_v21  ;;  %v2025_v29 = vcombine.high %v4225_v22, %v4938_v11  ;;  %v3078_v27 = vmov 0  }
 0x1c3   : > { %v2868_v55 = vpack.i.bf16 %v1794_v14, %v1329_v24  ;;  %v1956_v7 = vcombine.high %v4958_v39, %v4938_v11  ;;  %v4454_v15 = vrot.slane %v2152_v5, %v3591_v21  ;;  %v1560_v41 = vcombine.high %v4240_v46, %v4938_v11  ;;  %2409 = vmatprep.mubr.bf16.mxu0 %v3078_v27  ;;  %v4962_v27 = vld [vmem:[#allocation19_spill] sm:$0xff] }
 0x1c4   : > { %v2858_v19 = vpack.i.bf16 %v1725_v37, %v1260_v31  ;;  %v1491_v17 = vcombine.high %v4959_v45, %v4938_v11  ;;  %v2252_v22 = vcombine.high %v4447_v61, %v4938_v11  ;;  %v1261_v6 = vcombine.high %v4274_v43, %v4938_v11 }
 0x1c5   : > { %v2873_v35 = vpack.i.bf16 %v2025_v29, %v1560_v41  ;;  %v2184_v46 = vcombine.high %v4454_v15, %v4938_v11  ;;  %v1726_v56 = vcombine.high %v4285_v8, %v4938_v11  ;;  %v1330_v28 = vcombine.high %v4266_v25, %v4938_v11 }
 0x1c6   : > { %2834 = vrot.lane.b32.xlu1 %v2833_v12, %s3075_s8  ;;  %2819 = vrot.lane.b32.xlu0 %v2818_v53, %s3074_s7  ;;  %v2863_v49 = vpack.i.bf16 %v1956_v7, %v1491_v17  ;;  %v1957_v0 = vcombine.high %v4305_v50, %v4938_v11  ;;  %v1795_v43 = vcombine.high %v4282_v59, %v4938_v11 }
 0x1c7   : > { %v2888_v12 = vpack.i.bf16 %v2252_v22, %v2184_v46  ;;  %v2878_v26 = vpack.i.bf16 %v1726_v56, %v1261_v6  ;;  %v1492_v53 = vcombine.high %v4333_v16, %v4938_v11  ;;  %v2237_v8 = vcombine.high %v4249_v52, %v4252_v58 }
 0x1c8   : > { %v1262_v25 = vcombine.high %v4354_v54, %v4938_v11  ;;  %v2893_v32 = vpack.i.bf16 %v1795_v43, %v1330_v28  ;;  %v2253_v50 = vcombine.high %v4378_v18, %v4938_v11  ;;  %v2169_v59 = vcombine.high %v4261_v38, %v4236_v30 }
 0x1c9   : > { %v2883_v63 = vpack.i.bf16 %v1957_v0, %v1492_v53  ;;  %v1727_v3 = vcombine.high %v4368_v10, %v4938_v11  ;;  %v2185_v52 = vcombine.high %v4391_v20, %v4938_v11  ;;  %v2251_v58 = vrot.slane %v2237_v8, %v3591_v21 }
 0x1ca   : > { %2839 = vrot.lane.b32.xlu1 %v2838_v9, %s3074_s7  ;;  %2849 = vrot.lane.b32.xlu0 %v2848_v51, %s3075_s8  ;;  %v2254_v30 = vcombine.high %v4302_v57, %v4938_v11  ;;  %v2183_v10 = vrot.slane %v2169_v59, %v3591_v21  ;;  %v2186_v9 = vcombine.high %v4323_v42, %v4938_v11 }
 0x1cb   : > { %v2898_v18 = vpack.i.bf16 %v1727_v3, %v1262_v25  ;;  %v2903_v38 = vpack.i.bf16 %v2253_v50, %v2185_v52  ;;  %v2255_v60 = vcombine.high %v2251_v58, %v4938_v11 }
 0x1cc   : > { %v2913_v51 = vpack.i.bf16 %v2251_v58, %v2183_v10  ;;  %v2908_v62 = vpack.i.bf16 %v2254_v30, %v2186_v9  ;;  %v2187_v21 = vcombine.high %v2183_v10, %v4938_v11  ;;  %v4960_v10 = vld [vmem:[#allocation20_spill] sm:$0xff] }
 0x1ce   : > { %2844 = vrot.lane.b32.xlu1 %v2843_v1, %s3075_s8  ;;  %2854 = vrot.lane.b32.xlu0 %v2853_v48, %s3076_s14  ;;  %v2918_v24 = vpack.i.bf16 %v2255_v60, %v2187_v21 }
 0x1d0   : > { %v4497_v16 = vpop.permute.xlu0 %2609 }
 0x1d1   : > { %v2612_v29 = vunpack.i.h.bf16 %v4497_v16 }
 0x1d2   : > { %2869 = vrot.lane.b32.xlu1 %v2868_v55, %s3076_s14  ;;  %2859 = vrot.lane.b32.xlu0 %v2858_v19, %s3075_s8  ;;  %v2611_v55 = vunpack.i.l.bf16 %v4497_v16 }
 0x1d6   : > { %2874 = vrot.lane.b32.xlu1 %v2873_v35, %s3077_s27  ;;  %2864 = vrot.lane.b32.xlu0 %v2863_v49, %s3076_s14 }
 0x1d8   : > { %v4508_v20 = vpop.permute.xlu0 %2614 }
 0x1d9   : > { %v2617_v39 = vunpack.i.h.bf16 %v4508_v20  ;;  %v2616_v7 = vunpack.i.l.bf16 %v4508_v20  ;;  %v4961_v20 = vld [vmem:[#allocation18_spill] sm:$0xff] }
 0x1da   : > { %2889 = vrot.lane.b32.xlu1 %v2888_v12, %s3074_s7  ;;  %2879 = vrot.lane.b32.xlu0 %v2878_v26, %s3076_s14 }
 0x1de   : > { %2894 = vrot.lane.b32.xlu1 %v2893_v32, %s3077_s27  ;;  %2884 = vrot.lane.b32.xlu0 %v2883_v63, %s3077_s27 }
 0x1e0   : > { %v4499_v54 = vpop.permute.xlu1 %2619 }
 0x1e1   : > { %v2622_v19 = vunpack.i.h.bf16 %v4499_v54  ;;  %v2621_v41 = vunpack.i.l.bf16 %v4499_v54 }
 0x1e2   : > { %2899 = vrot.lane.b32.xlu1 %v2898_v18, %s3077_s27  ;;  %2904 = vrot.lane.b32.xlu0 %v2903_v38, %s3075_s8 }
 0x1e4   : > { %v4510_v13 = vpop.permute.xlu1 %2624 }
 0x1e5   : > { %v2627_v35 = vunpack.i.h.bf16 %v4510_v13  ;;  %v2626_v22 = vunpack.i.l.bf16 %v4510_v13 }
 0x1e6   : > { %2914 = vrot.lane.b32.xlu1 %v2913_v51, %s3073_s26  ;;  %2909 = vrot.lane.b32.xlu0 %v2908_v62, %s3076_s14 }
 0x1e8   : > { %v4516_v57 = vpop.permute.xlu1 %2649  ;;  %v4518_v42 = vpop.permute.xlu0 %2629 }
 0x1e9   : > { %v2652_v6 = vunpack.i.h.bf16 %v4516_v57  ;;  %v2651_v49 = vunpack.i.l.bf16 %v4516_v57  ;;  %v2632_v46 = vunpack.i.h.bf16 %v4518_v42  ;;  %v2631_v56 = vunpack.i.l.bf16 %v4518_v42 }
 0x1ea   : > { %2919 = vrot.lane.b32.xlu0 %v2918_v24, %s3077_s27  ;;  %v4963_v24 = vld [vmem:[#allocation17_spill] sm:$0xff] }
 0x1ec   : > { %v4521_v1 = vpop.permute.xlu1 %2654  ;;  %v4523_v31 = vpop.permute.xlu0 %2634 }
 0x1ed   : > { %v2657_v28 = vunpack.i.h.bf16 %v4521_v1  ;;  %v2656_v12 = vunpack.i.l.bf16 %v4521_v1  ;;  %v2637_v0 = vunpack.i.h.bf16 %v4523_v31  ;;  %v2636_v26 = vunpack.i.l.bf16 %v4523_v31 }
 0x1f0   : > { %v4525_v48 = vpop.permute.xlu1 %2659  ;;  %v4527_v5 = vpop.permute.xlu0 %2639 }
 0x1f1   : > { %v2662_v3 = vunpack.i.h.bf16 %v4525_v48  ;;  %v2661_v52 = vunpack.i.l.bf16 %v4525_v48  ;;  %v2642_v58 = vunpack.i.h.bf16 %v4527_v5  ;;  %v2641_v16 = vunpack.i.l.bf16 %v4527_v5 }
 0x1f4   : > { %v4529_v14 = vpop.permute.xlu1 %2664  ;;  %v4531_v23 = vpop.permute.xlu0 %2644 }
 0x1f5   : > { %v2647_v30 = vunpack.i.h.bf16 %v4531_v23  ;;  %v2646_v38 = vunpack.i.l.bf16 %v4531_v23 }
 0x1f8   : > { %v2675_v11 = vpop.permute.xlu1 %2674  ;;  %v2670_v37 = vpop.permute.xlu0 %2669 }
 0x1f9   : > { %v2672_v43 = vunpack.i.h.bf16 %v2670_v37  ;;  %v2671_v53 = vunpack.i.l.bf16 %v2670_v37  ;;  %v2677_v8 = vunpack.i.h.bf16 %v2675_v11  ;;  %v2676_v25 = vunpack.i.l.bf16 %v2675_v11  ;;  %v4964_v11 = vld [vmem:[#allocation22_spill] sm:$0xff] }
 0x1fb   : > { %v1164_v9 = vsel %vm443_vm5, %v4960_v10, %v2672_v43  ;;  %v695_v51 = vsel %vm443_vm5, %v4961_v20, %v2671_v53  ;;  %v1157_v21 = vsel %vm443_vm5, %v4962_v27, %v2677_v8  ;;  %v688_v5 = vsel %vm443_vm5, %v4963_v24, %v2676_v25 }
 0x1fc   : > { %v2680_v45 = vpop.permute.xlu1 %2679  ;;  %v4539_v17 = vpop.permute.xlu0 %2689  ;;  %v696_v8 = vsel %vm445_vm6, %v695_v51, %v2611_v55  ;;  %v1165_v20 = vsel %vm445_vm6, %v1164_v9, %v2612_v29 }
 0x1fd   : > { %v2682_v32 = vunpack.i.h.bf16 %v2680_v45  ;;  %v2681_v63 = vunpack.i.l.bf16 %v2680_v45  ;;  %v4965_v45 = vld [vmem:[#allocation23_spill] sm:$0xff]  ;;  %v2692_v43 = vunpack.i.h.bf16 %v4539_v17  ;;  %v2691_v53 = vunpack.i.l.bf16 %v4539_v17 }
 0x1fe   : > { %v689_v17 = vsel %vm445_vm6, %v688_v5, %v2616_v7 }
 0x1ff   : > { %v925_v37 = vsel %vm443_vm5, %v4964_v11, %v2682_v32  ;;  %v457_v23 = vsel %vm443_vm5, %v4965_v45, %v2681_v63 }
 0x200   : > { %v2685_v50 = vpop.permute.xlu1 %2684  ;;  %v2695_v59 = vpop.permute.xlu0 %2694  ;;  %v458_v63 = vsel %vm445_vm6, %v457_v23, %v2621_v41  ;;  %v926_v11 = vsel %vm445_vm6, %v925_v37, %v2622_v19 }
 0x201   : > { %v2687_v62 = vunpack.i.h.bf16 %v2685_v50  ;;  %v2686_v60 = vunpack.i.l.bf16 %v2685_v50  ;;  %v2697_v25 = vunpack.i.h.bf16 %v2695_v59  ;;  %v2696_v27 = vunpack.i.l.bf16 %v2695_v59  ;;  %v4966_v59 = vld [vmem:[#allocation21_spill] sm:$0xff] }
 0x202   : > { %v918_v51 = vsel %vm443_vm5, %v4966_v59, %v2692_v43 }
 0x203   : > { %v697_v32 = vsel %vm447_vm7, %v696_v8, %v2686_v60  ;;  %v1166_v24 = vsel %vm447_vm7, %v1165_v20, %v2687_v62  ;;  %v4967_v60 = vld [vmem:[#allocation24_spill] sm:$0xff]  ;;  %v690_v7 = vsel %vm447_vm7, %v689_v17, %v2696_v27  ;;  %v919_v13 = vsel %vm445_vm6, %v918_v51, %v2632_v46 }
 0x204   : > { %v2700_v54 = vpop.permute.xlu1 %2699  ;;  %v2720_v18 = vpop.permute.xlu0 %2719  ;;  %v444_v62 = vsel %vm443_vm5, %v4967_v60, %v2691_v53 }
 0x205   : > { %v2702_v10 = vunpack.i.h.bf16 %v2700_v54  ;;  %v2701_v50 = vunpack.i.l.bf16 %v2700_v54  ;;  %v1158_v54 = vsel %vm445_vm6, %v1157_v21, %v2617_v39  ;;  %v698_v39 = vsel %vm449_vm8, %v697_v32, %v2626_v22 }
 0x206   : > { %v1159_v19 = vsel %vm447_vm7, %v1158_v54, %v2697_v25  ;;  %v1167_v21 = vsel %vm449_vm8, %v1166_v24, %v2627_v35  ;;  %v446_v20 = vsel %vm445_vm6, %v444_v62, %v2631_v56 }
 0x207   : > { %v459_v45 = vsel %vm447_vm7, %v458_v63, %v2701_v50  ;;  %v927_v55 = vsel %vm447_vm7, %v926_v11, %v2702_v10  ;;  %v2722_v10 = vunpack.i.h.bf16 %v2720_v18  ;;  %v2721_v50 = vunpack.i.l.bf16 %v2720_v18 }
 0x208   : > { %v2705_v29 = vpop.permute.xlu1 %2704  ;;  %v2725_v9 = vpop.permute.xlu0 %2724  ;;  %v460_v5 = vsel %vm449_vm8, %v459_v45, %v2641_v16  ;;  %v928_v37 = vsel %vm449_vm8, %v927_v55, %v2642_v58  ;;  %v691_v58 = vsel %vm449_vm8, %v690_v7, %v2636_v26  ;;  %v1160_v18 = vsel %vm449_vm8, %v1159_v19, %v2637_v0 }
 0x209   : > { %v2707_v41 = vunpack.i.h.bf16 %v2705_v29  ;;  %v2706_v23 = vunpack.i.l.bf16 %v2705_v29  ;;  %v929_v25 = vsel %vm451_vm9, %v928_v37, %v2722_v10  ;;  %v461_v56 = vsel %vm451_vm9, %v460_v5, %v2721_v50 }
 0x20a   : > { %v2727_v26 = vunpack.i.h.bf16 %v2725_v9  ;;  %v2726_v11 = vunpack.i.l.bf16 %v2725_v9  ;;  %v462_v29 = vsel %vm453_vm10, %v461_v56, %v2661_v52  ;;  %v930_v57 = vsel %vm453_vm10, %v929_v25, %v2662_v3 }
 0x20b   : > { %v699_v43 = vsel %vm451_vm9, %v698_v39, %v2706_v23  ;;  %v1168_v53 = vsel %vm451_vm9, %v1167_v21, %v2707_v41  ;;  %v4968_v3 = vunpack.i.l.bf16 %v4529_v14  ;;  %v4969_v19 = vunpack.i.h.bf16 %v4529_v14 }
 0x20c   : > { %v2710_v8 = vpop.permute.xlu1 %2709  ;;  %v2730_v35 = vpop.permute.xlu0 %2729  ;;  %v700_v42 = vsel %vm453_vm10, %v699_v43, %v2646_v38  ;;  %v1169_v46 = vsel %vm453_vm10, %v1168_v53, %v2647_v30 }
 0x20d   : > { %v2712_v22 = vunpack.i.h.bf16 %v2710_v8  ;;  %v2711_v16 = vunpack.i.l.bf16 %v2710_v8  ;;  %v2732_v24 = vunpack.i.h.bf16 %v2730_v35  ;;  %v2731_v63 = vunpack.i.l.bf16 %v2730_v35 }
 0x20e   : > { %v701_v9 = vsel %vm455_vm11, %v700_v42, %v2726_v11 }
 0x20f   : > { %v448_v27 = vsel %vm447_vm7, %v446_v20, %v2711_v16  ;;  %v920_v32 = vsel %vm447_vm7, %v919_v13, %v2712_v22  ;;  %v2329_v53 = vrot.slane %v701_v9, 4 }
 0x210   : > { %v450_v31 = vsel %vm449_vm8, %v448_v27, %v2651_v49  ;;  %v921_v0 = vsel %vm449_vm8, %v920_v32, %v2652_v6  ;;  %v2715_v17 = vpop.permute.xlu1 %2714  ;;  %v2735_v38 = vpop.permute.xlu0 %2734  ;;  %v1170_v6 = vsel %vm455_vm11, %v1169_v46, %v2727_v26 }
 0x211   : > { %v452_v30 = vsel %vm451_vm9, %v450_v31, %v2731_v63  ;;  %v922_v54 = vsel %vm451_vm9, %v921_v0, %v2732_v24  ;;  %v2717_v45 = vunpack.i.h.bf16 %v2715_v17  ;;  %v2716_v55 = vunpack.i.l.bf16 %v2715_v17 }
 0x212   : > { %v2737_v51 = vunpack.i.h.bf16 %v2735_v38  ;;  %v2736_v60 = vunpack.i.l.bf16 %v2735_v38  ;;  %v454_v23 = vsel %vm453_vm10, %v452_v30, %v4968_v3  ;;  %v923_v7 = vsel %vm453_vm10, %v922_v54, %v4969_v19 }
 0x213   : > { %v692_v49 = vsel %vm451_vm9, %v691_v58, %v2716_v55  ;;  %v1161_v59 = vsel %vm451_vm9, %v1160_v18, %v2717_v45  ;;  %v2335_v10 = vrot.slane %v1170_v6, 4 }
 0x214   : > { %v693_v62 = vsel %vm453_vm10, %v692_v49, %v2656_v12  ;;  %v1162_v52 = vsel %vm453_vm10, %v1161_v59, %v2657_v28  ;;  %v2745_v41 = vpop.permute.xlu1 %2744  ;;  %v2740_v48 = vpop.permute.xlu0 %2739 }
 0x215   : > { %v694_v39 = vsel %vm455_vm11, %v693_v62, %v2736_v60  ;;  %v1163_v21 = vsel %vm455_vm11, %v1162_v52, %v2737_v51  ;;  %v2747_v5 = vunpack.i.h.bf16 %v2745_v41  ;;  %v2746_v12 = vunpack.i.l.bf16 %v2745_v41 }
 0x216   : > { %v2328_v37 = vrot.slane %v694_v39, 4  ;;  %v2334_v1 = vrot.slane %v1163_v21, 4  ;;  %v2742_v43 = vunpack.i.h.bf16 %v2740_v48  ;;  %v2741_v28 = vunpack.i.l.bf16 %v2740_v48 }
 0x217   : > { %v456_v50 = vsel %vm455_vm11, %v454_v23, %v2746_v12  ;;  %v924_v8 = vsel %vm455_vm11, %v923_v7, %v2747_v5 }
 0x218   : > { %v4651_v20 = vpop.permute.xlu1 %2769  ;;  %v4653_v14 = vpop.permute.xlu0 %2749  ;;  %v463_v13 = vsel %vm455_vm11, %v462_v29, %v2741_v28  ;;  %v931_v35 = vsel %vm455_vm11, %v930_v57, %v2742_v43  ;;  %v2351_v22 = vsel %vm2350_vm12, %v456_v50, %v2328_v37  ;;  %v2353_v16 = vsel %vm2350_vm12, %v924_v8, %v2334_v1 }
 0x219   : > { %v2352_v58 = vsel %vm2350_vm12, %v463_v13, %v2329_v53  ;;  %v2354_v18 = vsel %vm2350_vm12, %v931_v35, %v2335_v10  ;;  %v2359_v25 = vpack.c.bf16 %v2353_v16, %v2351_v22  ;;  %v2772_v45 = vunpack.i.h.bf16 %v4651_v20 }
 0x21a   : > { %v2360_v56 = vpack.c.bf16 %v2354_v18, %v2352_v58  ;;  %v2771_v55 = vunpack.i.l.bf16 %v4651_v20  ;;  %v2752_v29 = vunpack.i.h.bf16 %v4653_v14  ;;  %v2751_v9 = vunpack.i.l.bf16 %v4653_v14 }
 0x21c   : > { %v4661_v42 = vpop.permute.xlu1 %2774  ;;  %2377 = vmatprep.subr.bf16.mxu0 %v2360_v56  ;;  %v4663_v46 = vpop.permute.xlu0 %2754 }
 0x21d   : > { %2378 = vmatpush1.bf16.msra.mxu0 %v2359_v25  ;;  %v2777_v57 = vunpack.i.h.bf16 %v4661_v42  ;;  %v2776_v49 = vunpack.i.l.bf16 %v4661_v42  ;;  %v2757_v59 = vunpack.i.h.bf16 %v4663_v46  ;;  %v2756_v51 = vunpack.i.l.bf16 %v4663_v46 }
 0x220   : > { %v4665_v27 = vpop.permute.xlu1 %2779  ;;  %v4667_v32 = vpop.permute.xlu0 %2759 }
 0x221   : > { %v2782_v60 = vunpack.i.h.bf16 %v4665_v27  ;;  %v2781_v52 = vunpack.i.l.bf16 %v4665_v27  ;;  %v2762_v23 = vunpack.i.h.bf16 %v4667_v32  ;;  %v2761_v19 = vunpack.i.l.bf16 %v4667_v32 }
 0x224   : > { %v4669_v24 = vpop.permute.xlu1 %2784  ;;  %v4671_v63 = vpop.permute.xlu0 %2764 }
 0x225   : > { %v2787_v7 = vunpack.i.h.bf16 %v4669_v24  ;;  %v2786_v39 = vunpack.i.l.bf16 %v4669_v24  ;;  %v2767_v21 = vunpack.i.h.bf16 %v4671_v63  ;;  %v2766_v5 = vunpack.i.l.bf16 %v4671_v63 }
 0x228   : > { %v4673_v26 = vpop.permute.xlu1 %2799  ;;  %v4675_v11 = vpop.permute.xlu0 %2789 }
 0x229   : > { %v2802_v12 = vunpack.i.h.bf16 %v4673_v26  ;;  %v2801_v43 = vunpack.i.l.bf16 %v4673_v26  ;;  %v2792_v8 = vunpack.i.h.bf16 %v4675_v11  ;;  %v2791_v14 = vunpack.i.l.bf16 %v4675_v11 }
 0x22c   : > { %v4677_v31 = vpop.permute.xlu1 %2814  ;;  %v4679_v0 = vpop.permute.xlu0 %2794 }
 0x22d   : > { %v2797_v22 = vunpack.i.h.bf16 %v4679_v0  ;;  %v2796_v16 = vunpack.i.l.bf16 %v4679_v0 }
 0x230   : > { %v2825_v17 = vpop.permute.xlu1 %2824  ;;  %v4681_v38 = vpop.permute.xlu0 %2804 }
 0x231   : > { %v2826_v41 = vunpack.i.l.bf16 %v2825_v17  ;;  %v2827_v37 = vunpack.i.h.bf16 %v2825_v17  ;;  %v2807_v58 = vunpack.i.h.bf16 %v4681_v38 }
 0x233   : > { %v1617_v13 = vsel %vm443_vm5, %v4319_v47, %v2826_v41 }
 0x234   : > { %v2830_v30 = vpop.permute.xlu1 %2829  ;;  %v4683_v54 = vpop.permute.xlu0 %2809  ;;  %v1618_v17 = vsel %vm445_vm6, %v1617_v13, %v2756_v51 }
 0x235   : > { %v2832_v28 = vunpack.i.h.bf16 %v2830_v30  ;;  %v2831_v35 = vunpack.i.l.bf16 %v2830_v30 }
 0x237   : > { %v1859_v47 = vsel %vm443_vm5, %v4360_v44, %v2832_v28 }
 0x238   : > { %v2835_v6 = vpop.permute.xlu1 %2834  ;;  %v2820_v62 = vpop.permute.xlu0 %2819 }
 0x239   : > { %v2822_v48 = vunpack.i.h.bf16 %v2820_v62  ;;  %v2821_v3 = vunpack.i.l.bf16 %v2820_v62  ;;  %v2837_v32 = vunpack.i.h.bf16 %v2835_v6  ;;  %v2836_v63 = vunpack.i.l.bf16 %v2835_v6 }
 0x23a   : > { %v1394_v62 = vsel %vm443_vm5, %v4340_v33, %v2831_v35  ;;  %v2811_v33 = vunpack.i.l.bf16 %v4683_v54 }
 0x23b   : > { %v2089_v53 = vsel %vm443_vm5, %v4375_v34, %v2822_v48  ;;  %v1624_v10 = vsel %vm443_vm5, %v4388_v36, %v2821_v3  ;;  %v2806_v34 = vunpack.i.l.bf16 %v4681_v38  ;;  %v2082_v36 = vsel %vm443_vm5, %v4290_v4, %v2827_v37 }
 0x23c   : > { %v2840_v1 = vpop.permute.xlu1 %2839  ;;  %v2850_v50 = vpop.permute.xlu0 %2849  ;;  %v1625_v18 = vsel %vm445_vm6, %v1624_v10, %v2751_v9  ;;  %v2090_v25 = vsel %vm445_vm6, %v2089_v53, %v2752_v29  ;;  %v2812_v53 = vunpack.i.h.bf16 %v4683_v54  ;;  %v2083_v6 = vsel %vm445_vm6, %v2082_v36, %v2757_v59 }
 0x23d   : > { %v2841_v56 = vunpack.i.l.bf16 %v2840_v1  ;;  %v2842_v41 = vunpack.i.h.bf16 %v2840_v1  ;;  %v2852_v48 = vunpack.i.h.bf16 %v2850_v50  ;;  %v2851_v4 = vunpack.i.l.bf16 %v2850_v50 }
 0x23e   : > { %v1626_v29 = vsel %vm447_vm7, %v1625_v18, %v2836_v63  ;;  %v2091_v37 = vsel %vm447_vm7, %v2090_v25, %v2837_v32  ;;  %v1395_v1 = vsel %vm445_vm6, %v1394_v62, %v2761_v19  ;;  %v1860_v10 = vsel %vm445_vm6, %v1859_v47, %v2762_v23 }
 0x23f   : > { %v1387_v44 = vsel %vm443_vm5, %v4395_v40, %v2841_v56  ;;  %v1852_v35 = vsel %vm443_vm5, %v4407_v2, %v2842_v41  ;;  %v1396_v18 = vsel %vm447_vm7, %v1395_v1, %v2851_v4  ;;  %v1627_v25 = vsel %vm449_vm8, %v1626_v29, %v2766_v5 }
 0x240   : > { %v2845_v46 = vpop.permute.xlu1 %2844  ;;  %v2855_v30 = vpop.permute.xlu0 %2854  ;;  %v2092_v40 = vsel %vm449_vm8, %v2091_v37, %v2767_v21  ;;  %v1861_v59 = vsel %vm447_vm7, %v1860_v10, %v2852_v48  ;;  %v1388_v23 = vsel %vm445_vm6, %v1387_v44, %v2771_v55  ;;  %v1853_v55 = vsel %vm445_vm6, %v1852_v35, %v2772_v45 }
 0x241   : > { %v2847_v3 = vunpack.i.h.bf16 %v2845_v46  ;;  %v2846_v9 = vunpack.i.l.bf16 %v2845_v46  ;;  %v2856_v51 = vunpack.i.l.bf16 %v2855_v30  ;;  %v2857_v50 = vunpack.i.h.bf16 %v2855_v30 }
 0x242   : > { %v1862_v4 = vsel %vm449_vm8, %v1861_v59, %v2782_v60 }
 0x243   : > { %v1619_v36 = vsel %vm447_vm7, %v1618_v17, %v2846_v9  ;;  %v2084_v56 = vsel %vm447_vm7, %v2083_v6, %v2847_v3  ;;  %v1628_v19 = vsel %vm451_vm9, %v1627_v25, %v2856_v51  ;;  %v2093_v5 = vsel %vm451_vm9, %v2092_v40, %v2857_v50 }
 0x244   : > { %v2870_v28 = vpop.permute.xlu1 %2869  ;;  %v2860_v13 = vpop.permute.xlu0 %2859  ;;  %v1397_v17 = vsel %vm449_vm8, %v1396_v18, %v2781_v52  ;;  %v1629_v3 = vsel %vm453_vm10, %v1628_v19, %v2786_v39  ;;  %v1620_v9 = vsel %vm449_vm8, %v1619_v36, %v2776_v49  ;;  %v2085_v20 = vsel %vm449_vm8, %v2084_v56, %v2777_v57 }
 0x245   : > { %v2872_v46 = vunpack.i.h.bf16 %v2870_v28  ;;  %v2871_v2 = vunpack.i.l.bf16 %v2870_v28  ;;  %v2861_v47 = vunpack.i.l.bf16 %v2860_v13  ;;  %v2862_v63 = vunpack.i.h.bf16 %v2860_v13 }
 0x246   : > { %v2094_v60 = vsel %vm453_vm10, %v2093_v5, %v2787_v7 }
 0x247   : > { %v1398_v45 = vsel %vm451_vm9, %v1397_v17, %v2871_v2  ;;  %v1863_v52 = vsel %vm451_vm9, %v1862_v4, %v2872_v46  ;;  %v1389_v27 = vsel %vm447_vm7, %v1388_v23, %v2861_v47  ;;  %v1854_v39 = vsel %vm447_vm7, %v1853_v55, %v2862_v63 }
 0x248   : > { %v2875_v32 = vpop.permute.xlu1 %2874  ;;  %v2865_v62 = vpop.permute.xlu0 %2864  ;;  %v1390_v24 = vsel %vm449_vm8, %v1389_v27, %v2791_v14  ;;  %v1399_v7 = vsel %vm453_vm10, %v1398_v45, %v2801_v43  ;;  %v1864_v10 = vsel %vm453_vm10, %v1863_v52, %v2802_v12  ;;  %v1855_v18 = vsel %vm449_vm8, %v1854_v39, %v2792_v8 }
 0x249   : > { %v2877_v21 = vunpack.i.h.bf16 %v2875_v32  ;;  %v2876_v30 = vunpack.i.l.bf16 %v2875_v32  ;;  %v2867_v41 = vunpack.i.h.bf16 %v2865_v62  ;;  %v2866_v48 = vunpack.i.l.bf16 %v2865_v62 }
 0x24a   : > { %v2816_v45 = vunpack.i.l.bf16 %v4677_v31 }
 0x24b   : > { %v1630_v37 = vsel %vm455_vm11, %v1629_v3, %v2876_v30  ;;  %v2095_v49 = vsel %vm455_vm11, %v2094_v60, %v2877_v21  ;;  %v1621_v42 = vsel %vm451_vm9, %v1620_v9, %v2866_v48  ;;  %v2086_v44 = vsel %vm451_vm9, %v2085_v20, %v2867_v41 }
 0x24c   : > { %v2890_v29 = vpop.permute.xlu1 %2889  ;;  %v2880_v57 = vpop.permute.xlu0 %2879  ;;  %v2341_v50 = vrot.slane %v1630_v37, 4  ;;  %v2347_v13 = vrot.slane %v2095_v49, 4  ;;  %v1622_v43 = vsel %vm453_vm10, %v1621_v42, %v2796_v16  ;;  %v2087_v26 = vsel %vm453_vm10, %v2086_v44, %v2797_v22 }
 0x24d   : > { %v2892_v6 = vunpack.i.h.bf16 %v2890_v29  ;;  %v2882_v51 = vunpack.i.h.bf16 %v2880_v57  ;;  %v2881_v28 = vunpack.i.l.bf16 %v2880_v57  ;;  %v2891_v1 = vunpack.i.l.bf16 %v2890_v29 }
 0x24e   : > { %v2817_v20 = vunpack.i.h.bf16 %v4677_v31 }
 0x24f   : > { %v1391_v35 = vsel %vm451_vm9, %v1390_v24, %v2881_v28  ;;  %v2319_v12 = vsel %vm443_vm5, %v4447_v61, %v2892_v6  ;;  %v1856_v36 = vsel %vm451_vm9, %v1855_v18, %v2882_v51  ;;  %v2312_v8 = vsel %vm443_vm5, %v4454_v15, %v2891_v1 }
 0x250   : > { %v2895_v25 = vpop.permute.xlu1 %2894  ;;  %v2885_v14 = vpop.permute.xlu0 %2884  ;;  %v1392_v0 = vsel %vm453_vm10, %v1391_v35, %v2806_v34  ;;  %v1857_v5 = vsel %vm453_vm10, %v1856_v36, %v2807_v58  ;;  %v2313_v41 = vsel %vm445_vm6, %v2312_v8, %v2811_v33  ;;  %v2320_v48 = vsel %vm445_vm6, %v2319_v12, %v2812_v53 }
 0x251   : > { %v2897_v40 = vunpack.i.h.bf16 %v2895_v25  ;;  %v2896_v59 = vunpack.i.l.bf16 %v2895_v25  ;;  %v2887_v11 = vunpack.i.h.bf16 %v2885_v14  ;;  %v2886_v56 = vunpack.i.l.bf16 %v2885_v14 }
 0x253   : > { %v1400_v23 = vsel %vm455_vm11, %v1399_v7, %v2896_v59  ;;  %v1865_v19 = vsel %vm455_vm11, %v1864_v10, %v2897_v40  ;;  %v1623_v22 = vsel %vm455_vm11, %v1622_v43, %v2886_v56  ;;  %v2088_v16 = vsel %vm455_vm11, %v2087_v26, %v2887_v11  ;;  %v2365_v10 = vld [vmem:[#allocation6] sm:$0xf] }
 0x254   : > { %v2900_v61 = vpop.permute.xlu1 %2899  ;;  %v2356_v46 = vsel %vm2350_vm12, %v1400_v23, %v2341_v50  ;;  %v2358_v2 = vsel %vm2350_vm12, %v1865_v19, %v2347_v13  ;;  %v2340_v47 = vrot.slane %v1623_v22, 4  ;;  %v2905_v63 = vpop.permute.xlu0 %2904  ;;  %v2346_v21 = vrot.slane %v2088_v16, 4 }
 0x255   : > { %v2902_v32 = vunpack.i.h.bf16 %v2900_v61  ;;  %v2901_v15 = vunpack.i.l.bf16 %v2900_v61  ;;  %v2907_v30 = vunpack.i.h.bf16 %v2905_v63  ;;  %v2906_v34 = vunpack.i.l.bf16 %v2905_v63 }
 0x256   : > { %v2362_v62 = vpack.c.bf16 %v2358_v2, %v2356_v46 }
 0x257   : > { %v1393_v17 = vsel %vm455_vm11, %v1392_v0, %v2901_v15  ;;  %v1858_v55 = vsel %vm455_vm11, %v1857_v5, %v2902_v32  ;;  %v2314_v38 = vsel %vm447_vm7, %v2313_v41, %v2906_v34  ;;  %v2321_v58 = vsel %vm447_vm7, %v2320_v48, %v2907_v30 }
 0x258   : > { %2379 = vmatprep.subr.bf16.mxu0 %v2362_v62  ;;  %v2915_v4 = vpop.permute.xlu1 %2914  ;;  %v2355_v3 = vsel %vm2350_vm12, %v1393_v17, %v2340_v47  ;;  %v2357_v9 = vsel %vm2350_vm12, %v1858_v55, %v2346_v21  ;;  %v2910_v52 = vpop.permute.xlu0 %2909  ;;  %v2315_v29 = vsel %vm449_vm8, %v2314_v38, %v2816_v45  ;;  %v2322_v39 = vsel %vm449_vm8, %v2321_v58, %v2817_v20 }
 0x259   : > { %v2912_v33 = vunpack.i.h.bf16 %v2910_v52  ;;  %v2911_v27 = vunpack.i.l.bf16 %v2910_v52  ;;  %v2361_v54 = vpack.c.bf16 %v2357_v9, %v2355_v3  ;;  %v2917_v60 = vunpack.i.h.bf16 %v2915_v4 }
 0x25a   : > { %v2916_v53 = vunpack.i.l.bf16 %v2915_v4 }
 0x25b   : > { %v2316_v37 = vsel %vm451_vm9, %v2315_v29, %v2911_v27  ;;  %v2323_v49 = vsel %vm451_vm9, %v2322_v39, %v2912_v33  ;;  %2380 = vmatpush1.bf16.msra.mxu0 %v2361_v54 }
 0x25c   : > { %v2920_v42 = vpop.permute.xlu0 %2919  ;;  %v2324_v31 = vsel %vm453_vm10, %v2323_v49, %v2917_v60  ;;  %v2317_v6 = vsel %vm453_vm10, %v2316_v37, %v2916_v53 }
 0x25d   : > { %v2922_v57 = vunpack.i.h.bf16 %v2920_v42  ;;  %v2921_v44 = vunpack.i.l.bf16 %v2920_v42 }
 0x25f   : > { %v2325_v51 = vsel %vm455_vm11, %v2324_v31, %v2922_v57  ;;  %v2318_v28 = vsel %vm455_vm11, %v2317_v6, %v2921_v44 }
 0x260   : > { %v2364_v1 = vpack.c.bf16 %v2325_v51, %v2325_v51  ;;  %v2363_v24 = vpack.c.bf16 %v2318_v28, %v2318_v28 }
 0x262   : > { %2526 = vmatprep.subr.msk.bf16.mxu0 %vm2370_vm13, %v2364_v1  ;;  %v2372_v7 = vsel %vm2370_vm13, %v2363_v24, 0 }
 0x263   : > { %2382 = vmatpush1.bf16.msra.mxu0 %v2372_v7 }
 0x266   : > { %2527 = vmatmul.mubr.msk.bf16.vlgmr.msra.gmra.mrb[0].mxu0 %vm2366_vm14, %v2365_v10 }
 0x339   : > { %v2411_v50 = vpop.f32.mrb[0].mxu0 }
 0x33a   : > { %2418 = vst [vmem:[%s174_s17] sm:$0xff] %v2411_v50  ;;  %v2413_v13 = vpop.f32.mrb[1].mxu0 }
 0x33b   : > { %2419 = vst [vmem:[%s174_s17 + $0x8] sm:$0xff] %v2413_v13  ;;  %v2415_v35 = vpop.f32.mrb[2].mxu0 }
 0x33c   : > { %v2416_v18 = vpop.f32.mrb[3].mxu0 }
 0x33d   : > { %3002 = shalt.err (!%p2999_p13)
}
 0x33e   : > { %s3003_s4 = scalar_lea.hbm %s4840_s25, 256  ;;  %s3007_s26 = scalar_lea.hbm %s4884_s2, 512 }
 0x33f   : > { %p3004_p7 = scmp.ne.s32.totalorder %s4840_s25, %s3003_s4  ;;  %p3008_p1 = scmp.lt.u32.totalorder %s4840_s25, %s4884_s2 }
 0x340   : > { %p3009_p11 = scmp.lt.u32.totalorder %s3007_s26, %s3003_s4  ;;  %p3011_p9 = scmp.lt.u32.totalorder %s3003_s4, %s4840_s25 }
 0x341   : > { %p3005_p3 = pnand %p3004_p7, %p4970_p10 }
 0x342   : > { %p3010_p8 = por %p3009_p11, %p3008_p1 }
 0x343   : > { %p3006_p12 = pneg %p3005_p3 }
 0x344   : > { %p3012_p2 = por %p3011_p9, %p3010_p8 }
 0x346   : > { %p3013_p4 = pnand %p3012_p2, %p3006_p12 }
 0x348   : > { %3016 = shalt.err (!%p3013_p4)
}
 0x349   : > { %2541 = dma.vmem_to_hbm [thread:$0]  (%p4970_p10), %s4835_s19, 256, %s4840_s25, %s2421_s29  }
 0x34a PF: > { %s2447_s14 = sand.u32 1, %s3047_s9   ;;  %p4971_p5 = scmp.ne.s32.totalorder %s4911_s22, 0 }
 0x34b   : > { %p4972_p0 = scmp.ge.s32.totalorder %s3059_s12, 2  ;;  %s2448_s27 = scalar_lea.sflag [#allocation5], %s2447_s14 }
 0x34d   : > { %p2552_p6 = pnand %p4972_p0, %p4971_p5 }
 0x34f   : > { %3042 = dma.done.wait (!%p2552_p6), %s2448_s27, 256  }
 0x350   : > { %3044 = vsyncadd (!%p2552_p6), %s2448_s27, 4294967040  ;;  %p16_p13 = scmp.ge.s32.totalorder %s3120_s15, 4   ;;  %s4973_s9 = smov %s3051_s10 }
 0x351   : > { %s4974_s10 = smov %s3055_s11  ;;  %s4975_s11 = smov %s3132_s18 }
 0x352   : > { %s4976_s12 = smov %s3120_s15  ;;  %18 = sbr.rel (!%p16_p13) target bundleno = 6 (0x6), region = 77 }
 0x359   :  { %2453 = vsyncpa [#allocation4], 1 }
 0x35a   :  { %2455 = vsyncpa [#allocation4 + $0x1], 1 }
 0x35b   :  { %2456 = vsyncpa [#allocation7], 1 }
 0x35c   :  { %2457 = vsyncpa [#allocation5], 1 }
 0x35d   :  { %2459 = vsyncpa [#allocation5 + $0x1], 1 }

</bundles_post_ra>
